<compile_context>
chip_gen: v6e
topology: v6e:2x2x1
jax: 0.10.0
libtpu: 0.0.40
codegen_flags: <defaults>
</compile_context>

<pallas_src>
import math

import jax
import jax.numpy as jnp
from jax.experimental import pallas as pl
from jax.experimental.pallas import tpu as pltpu

# ---------------- small synthetic XLM-RoBERTa config ----------------
VOCAB = 128
HIDDEN = 32
N_LAYERS = 2
N_HEADS = 2
HEAD_DIM = HIDDEN // N_HEADS
INTERMEDIATE = 64
MAX_POS = 64
PAD_ID = 1            # XLM-RoBERTa pad_token_id
LN_EPS = 1e-5
OUT_SIZE = 1
ATTN_SCALE = 1.0 / math.sqrt(HEAD_DIM)


# ---------------- in-kernel helpers ----------------
def _gelu_tanh(x):
    # TODO(synk): HF XLM-RoBERTa uses exact erf-GELU; tanh approximation used here
    # (tanh has a native EUP op, erf does not).
    c = math.sqrt(2.0 / math.pi)
    return 0.5 * x * (1.0 + jnp.tanh(c * (x + 0.044715 * x * x * x)))


def _layernorm(x, g, b):
    mu = jnp.mean(x, axis=-1, keepdims=True)
    var = jnp.mean((x - mu) ** 2, axis=-1, keepdims=True)
    return (x - mu) * jax.lax.rsqrt(var + LN_EPS) * g + b


# ---------------- fused encoder kernel (one grid step = BT sequences) ----------------
def _encoder_kernel(x_ref, mask_ref,
                    emb_g_ref, emb_b_ref,
                    wqkv_ref, bqkv_ref,
                    wo_ref, bo_ref,
                    ln1_g_ref, ln1_b_ref,
                    wi_ref, bi_ref,
                    wf_ref, bf_ref,
                    ln2_g_ref, ln2_b_ref,
                    out_ref):
    BT, S, H = x_ref.shape
    M = BT * S
    bf16 = jnp.bfloat16

    # flatten the BT-sequence tile to one (M, H) token slab -> filled MXU M dimension
    x = x_ref[...].astype(jnp.float32).reshape(M, H)
    h = _layernorm(x, emb_g_ref[...], emb_b_ref[...])               # (M, H) f32

    # additive key bias built in-kernel from the raw 0/1 mask: (BT, 1, S)
    bias = (1.0 - mask_ref[...].astype(jnp.float32)) * -1e9

    # TODO(synk): at real XLM-R sizes replace this static unroll with a layer grid
    # axis ("arbitrary") so per-layer weights are streamed (double-buffered) instead
    # of keeping all layers VMEM-resident.
    for l in range(N_LAYERS):
        # ---- self-attention: fused QKV projection, bf16 in / f32 accumulate ----
        qkv = jnp.dot(h.astype(bf16), wqkv_ref[l],
                      preferred_element_type=jnp.float32) + bqkv_ref[l]   # (M, 3H) f32

        ctx_heads = []
        for hd in range(N_HEADS):                                   # static unroll
            lo = hd * HEAD_DIM
            q = (qkv[:, lo:lo + HEAD_DIM] * ATTN_SCALE).reshape(BT, S, HEAD_DIM)
            k = qkv[:, H + lo:H + lo + HEAD_DIM].reshape(BT, S, HEAD_DIM)
            v = qkv[:, 2 * H + lo:2 * H + lo + HEAD_DIM].reshape(BT, S, HEAD_DIM)

            # batched over the BT tile -> one dot_general per head instead of BT of them
            s = jnp.einsum('bqd,bkd->bqk',
                           q.astype(bf16), k.astype(bf16),
                           preferred_element_type=jnp.float32)       # (BT, S, S)
            s = s + bias
            s = s - jnp.max(s, axis=-1, keepdims=True)
            p = jnp.exp(s)
            p = p / jnp.sum(p, axis=-1, keepdims=True)               # exact softmax
            ctx = jnp.einsum('bqk,bkd->bqd',
                             p.astype(bf16), v.astype(bf16),
                             preferred_element_type=jnp.float32)     # (BT, S, Dh)
            ctx_heads.append(ctx.reshape(M, HEAD_DIM))

        # single (M, H) x (H, H) output projection (no per-head partial Wo dots)
        ctx_cat = jnp.concatenate(ctx_heads, axis=-1)                # (M, H)
        attn_out = jnp.dot(ctx_cat.astype(bf16), wo_ref[l],
                           preferred_element_type=jnp.float32) + bo_ref[l]
        h = _layernorm(attn_out + h, ln1_g_ref[l], ln1_b_ref[l])

        # ---- feed-forward ----
        inter = _gelu_tanh(
            jnp.dot(h.astype(bf16), wi_ref[l],
                    preferred_element_type=jnp.float32) + bi_ref[l])
        ffn = jnp.dot(inter.astype(bf16), wf_ref[l],
                      preferred_element_type=jnp.float32) + bf_ref[l]
        h = _layernorm(ffn + h, ln2_g_ref[l], ln2_b_ref[l])

    # only the CLS rows leave VMEM
    out_ref[...] = h.reshape(BT, S, H)[:, 0:1, :].astype(out_ref.dtype)


# ---------------- batch-tile selection ----------------
def _choose_bt(B, S, target_rows=256, min_steps=2):
    """Largest per-step batch tile that fills the MXU M dim while keeping >= min_steps
    grid steps (when B allows) so "parallel" still shards across v7x's 2 TensorCores."""
    best = 1
    for cand in range(1, B + 1):
        if B % cand:
            continue
        if (B // cand) >= min_steps or B < min_steps:
            best = cand
        if best * S >= target_rows:
            break
    return best


# ---------------- deterministic parameter init (stacked per-layer weights) ----------------
def init_params(key):
    cnt = [0]

    def nk():
        cnt[0] += 1
        return jax.random.fold_in(key, cnt[0])

    def w(shape):
        return jax.random.normal(nk(), shape, jnp.float32) * 0.02

    params = {
        "word_emb": w((VOCAB, HIDDEN)),
        "pos_emb": w((MAX_POS, HIDDEN)),
        "type_emb": w((1, HIDDEN)),
        "emb_ln_g": jnp.ones((1, HIDDEN), jnp.float32),
        "emb_ln_b": jnp.zeros((1, HIDDEN), jnp.float32),
    }

    wqkv, bqkv, wo, bo = [], [], [], []
    ln1_g, ln1_b = [], []
    wi, bi, wf, bf = [], [], [], []
    ln2_g, ln2_b = [], []
    for _ in range(N_LAYERS):
        wq, bq = w((HIDDEN, HIDDEN)), w((1, HIDDEN))
        wk, bk = w((HIDDEN, HIDDEN)), w((1, HIDDEN))
        wv, bv = w((HIDDEN, HIDDEN)), w((1, HIDDEN))
        wqkv.append(jnp.concatenate([wq, wk, wv], axis=1))        # (H, 3H) packed QKV
        bqkv.append(jnp.concatenate([bq, bk, bv], axis=1))        # (1, 3H)
        wo.append(w((HIDDEN, HIDDEN)))
        bo.append(w((1, HIDDEN)))
        ln1_g.append(jnp.ones((1, HIDDEN), jnp.float32))
        ln1_b.append(jnp.zeros((1, HIDDEN), jnp.float32))
        wi.append(w((HIDDEN, INTERMEDIATE)))
        bi.append(w((1, INTERMEDIATE)))
        wf.append(w((INTERMEDIATE, HIDDEN)))
        bf.append(w((1, HIDDEN)))
        ln2_g.append(jnp.ones((1, HIDDEN), jnp.float32))
        ln2_b.append(jnp.zeros((1, HIDDEN), jnp.float32))

    params.update({
        "wqkv": jnp.stack(wqkv), "bqkv": jnp.stack(bqkv),
        "wo": jnp.stack(wo), "bo": jnp.stack(bo),
        "ln1_g": jnp.stack(ln1_g), "ln1_b": jnp.stack(ln1_b),
        "wi": jnp.stack(wi), "bi": jnp.stack(bi),
        "wf": jnp.stack(wf), "bf": jnp.stack(bf),
        "ln2_g": jnp.stack(ln2_g), "ln2_b": jnp.stack(ln2_b),
    })
    # self.out = Linear(hidden, out_size) with fc=[]; N=1 head stays in the JAX wrapper.
    params["head_w"] = w((HIDDEN, OUT_SIZE))
    params["head_b"] = w((1, OUT_SIZE))
    return params


# ---------------- forward pass (gathers/head in JAX, encoder fused in Pallas) ----------------
def xlm_roberta_forward(params, input_ids, attention_mask):
    B, S = input_ids.shape
    BT = _choose_bt(B, S)

    # RoBERTa-style position ids: cumsum of non-pad tokens, offset by pad_id
    tok_mask = (input_ids != PAD_ID).astype(jnp.int32)
    pos_ids = jnp.cumsum(tok_mask, axis=1) * tok_mask + PAD_ID

    word = jnp.take(params["word_emb"], input_ids, axis=0)        # (B, S, H)
    pos = jnp.take(params["pos_emb"], pos_ids, axis=0)            # (B, S, H)
    emb = word + pos + params["type_emb"][0]                      # (B, S, H) f32

    # raw 0/1 mask; the -1e9 additive bias is built inside the kernel
    mask = attention_mask.astype(jnp.float32)[:, None, :]         # (B, 1, S)

    bf16 = jnp.bfloat16
    weights = (
        params["emb_ln_g"], params["emb_ln_b"],
        params["wqkv"].astype(bf16), params["bqkv"],              # bf16 MXU operands
        params["wo"].astype(bf16), params["bo"],
        params["ln1_g"], params["ln1_b"],
        params["wi"].astype(bf16), params["bi"],
        params["wf"].astype(bf16), params["bf"],
        params["ln2_g"], params["ln2_b"],
    )

    def wspec(shape):
        # Whole array, VMEM-resident, constant block index (no per-step re-DMA).
        # TODO(synk): on v7x add pipeline_mode=pl.Buffered(1) to single-buffer these
        # constant blocks once weight residency matters at real XLM-R sizes.
        n = len(shape)
        return pl.BlockSpec(shape, lambda b, _n=n: (0,) * _n)

    pooled = pl.pallas_call(
        _encoder_kernel,
        out_shape=jax.ShapeDtypeStruct((B, 1, HIDDEN), jnp.float32),
        grid=(B // BT,),
        in_specs=[
            pl.BlockSpec((BT, S, HIDDEN), lambda b: (b, 0, 0)),   # BT sequences / step
            pl.BlockSpec((BT, 1, S), lambda b: (b, 0, 0)),        # 0/1 mask per tile
        ] + [wspec(wt.shape) for wt in weights],
        out_specs=pl.BlockSpec((BT, 1, HIDDEN), lambda b: (b, 0, 0)),
        # TODO(synk): set vmem_limit_bytes explicitly (weights + 2x activation tiles)
        # once BT*S grows enough to hit the default scoped-VMEM cap.
        compiler_params=pltpu.CompilerParams(
            dimension_semantics=("parallel",)),                   # shards over 2 TCs on v7x
    )(emb, mask, *weights)

    pooled = pooled.reshape(B, HIDDEN)   # hidden_state[:, 0]; drop_xlm_roberta is identity in eval
    logits = pooled @ params["head_w"] + params["head_b"]         # (B, OUT_SIZE)
    # out_activation is None by default -> return raw logits
    return logits


if __name__ == "__main__":
    key = jax.random.PRNGKey(0)
    params = init_params(key)

    B, S = 2, 8
    kid, _ = jax.random.split(jax.random.fold_in(key, 999))
    input_ids = jax.random.randint(kid, (B, S), 2, VOCAB)
    attention_mask = jnp.ones((B, S), jnp.int32)
    attention_mask = attention_mask.at[1, 5:].set(0)              # 2nd sequence has padding
    input_ids = jnp.where(attention_mask == 1, input_ids, PAD_ID)

    out = jax.jit(xlm_roberta_forward)(params, input_ids, attention_mask)
    out = jax.block_until_ready(out)
    assert out.shape == (B, OUT_SIZE) and out.dtype == jnp.float32
    print("KERNEL_OK")
</pallas_src>

<mosaic_0001>
module attributes {stable_mosaic.version = 11 : i64} {
  func.func @_encoder_kernel(%arg0: i32, %arg1: memref<1x8x32xf32, #tpu.memory_space<vmem>>, %arg2: memref<1x1x8xf32, #tpu.memory_space<vmem>>, %arg3: memref<1x32xf32, #tpu.memory_space<vmem>>, %arg4: memref<1x32xf32, #tpu.memory_space<vmem>>, %arg5: memref<2x32x96xbf16, #tpu.memory_space<vmem>>, %arg6: memref<2x1x96xf32, #tpu.memory_space<vmem>>, %arg7: memref<2x32x32xbf16, #tpu.memory_space<vmem>>, %arg8: memref<2x1x32xf32, #tpu.memory_space<vmem>>, %arg9: memref<2x1x32xf32, #tpu.memory_space<vmem>>, %arg10: memref<2x1x32xf32, #tpu.memory_space<vmem>>, %arg11: memref<2x32x64xbf16, #tpu.memory_space<vmem>>, %arg12: memref<2x1x64xf32, #tpu.memory_space<vmem>>, %arg13: memref<2x64x32xbf16, #tpu.memory_space<vmem>>, %arg14: memref<2x1x32xf32, #tpu.memory_space<vmem>>, %arg15: memref<2x1x32xf32, #tpu.memory_space<vmem>>, %arg16: memref<2x1x32xf32, #tpu.memory_space<vmem>>, %arg17: memref<1x1x32xf32, #tpu.memory_space<vmem>>) attributes {dimension_semantics = [#tpu.dimension_semantics<parallel>], iteration_bounds = array<i64: 2>, scalar_prefetch = 0 : i64, scratch_operands = 0 : i64, tpu.core_type = #tpu.core_type<tc>, window_params = [{transform_indices = @transform_0, window_bounds = array<i64: 1, 8, 32>}, {transform_indices = @transform_1, window_bounds = array<i64: 1, 1, 8>}, {pipeline_mode = #tpu.pipeline_mode<synchronous>, transform_indices = @transform_2, window_bounds = array<i64: 1, 32>}, {pipeline_mode = #tpu.pipeline_mode<synchronous>, transform_indices = @transform_3, window_bounds = array<i64: 1, 32>}, {pipeline_mode = #tpu.pipeline_mode<synchronous>, transform_indices = @transform_4, window_bounds = array<i64: 2, 32, 96>}, {pipeline_mode = #tpu.pipeline_mode<synchronous>, transform_indices = @transform_5, window_bounds = array<i64: 2, 1, 96>}, {pipeline_mode = #tpu.pipeline_mode<synchronous>, transform_indices = @transform_6, window_bounds = array<i64: 2, 32, 32>}, {pipeline_mode = #tpu.pipeline_mode<synchronous>, transform_indices = @transform_7, window_bounds = array<i64: 2, 1, 32>}, {pipeline_mode = #tpu.pipeline_mode<synchronous>, transform_indices = @transform_8, window_bounds = array<i64: 2, 1, 32>}, {pipeline_mode = #tpu.pipeline_mode<synchronous>, transform_indices = @transform_9, window_bounds = array<i64: 2, 1, 32>}, {pipeline_mode = #tpu.pipeline_mode<synchronous>, transform_indices = @transform_10, window_bounds = array<i64: 2, 32, 64>}, {pipeline_mode = #tpu.pipeline_mode<synchronous>, transform_indices = @transform_11, window_bounds = array<i64: 2, 1, 64>}, {pipeline_mode = #tpu.pipeline_mode<synchronous>, transform_indices = @transform_12, window_bounds = array<i64: 2, 64, 32>}, {pipeline_mode = #tpu.pipeline_mode<synchronous>, transform_indices = @transform_13, window_bounds = array<i64: 2, 1, 32>}, {pipeline_mode = #tpu.pipeline_mode<synchronous>, transform_indices = @transform_14, window_bounds = array<i64: 2, 1, 32>}, {pipeline_mode = #tpu.pipeline_mode<synchronous>, transform_indices = @transform_15, window_bounds = array<i64: 2, 1, 32>}, {transform_indices = @transform_16, window_bounds = array<i64: 1, 1, 32>}]} {
    %c0 = arith.constant 0 : index
    %c0_0 = arith.constant 0 : index
    %c0_1 = arith.constant 0 : index
    %0 = vector.load %arg1[%c0, %c0_0, %c0_1] : memref<1x8x32xf32, #tpu.memory_space<vmem>>, vector<1x8x32xf32>
    %1 = vector.shape_cast %0 : vector<1x8x32xf32> to vector<8x32xf32>
    %c0_2 = arith.constant 0 : index
    %c0_3 = arith.constant 0 : index
    %2 = vector.load %arg3[%c0_2, %c0_3] : memref<1x32xf32, #tpu.memory_space<vmem>>, vector<1x32xf32>
    %c0_4 = arith.constant 0 : index
    %c0_5 = arith.constant 0 : index
    %3 = vector.load %arg4[%c0_4, %c0_5] : memref<1x32xf32, #tpu.memory_space<vmem>>, vector<1x32xf32>
    %cst = arith.constant dense<0.000000e+00> : vector<8xf32>
    %4 = vector.multi_reduction <add>, %1, %cst [1] : vector<8x32xf32> to vector<8xf32>
    %5 = vector.shape_cast %4 : vector<8xf32> to vector<8x1xf32>
    %cst_6 = arith.constant 3.200000e+01 : f32
    %6 = vector.broadcast %cst_6 : f32 to vector<8x1xf32>
    %7 = arith.divf %5, %6 : vector<8x1xf32>
    %8 = vector.broadcast %7 : vector<8x1xf32> to vector<8x32xf32>
    %9 = arith.subf %1, %8 : vector<8x32xf32>
    %10 = arith.mulf %9, %9 : vector<8x32xf32>
    %cst_7 = arith.constant dense<0.000000e+00> : vector<8xf32>
    %11 = vector.multi_reduction <add>, %10, %cst_7 [1] : vector<8x32xf32> to vector<8xf32>
    %12 = vector.shape_cast %11 : vector<8xf32> to vector<8x1xf32>
    %cst_8 = arith.constant 3.200000e+01 : f32
    %13 = vector.broadcast %cst_8 : f32 to vector<8x1xf32>
    %14 = arith.divf %12, %13 : vector<8x1xf32>
    %15 = vector.broadcast %7 : vector<8x1xf32> to vector<8x32xf32>
    %16 = arith.subf %1, %15 : vector<8x32xf32>
    %cst_9 = arith.constant 9.99999974E-6 : f32
    %17 = vector.broadcast %cst_9 : f32 to vector<8x1xf32>
    %18 = arith.addf %14, %17 : vector<8x1xf32>
    %19 = math.rsqrt %18 : vector<8x1xf32>
    %20 = vector.broadcast %19 : vector<8x1xf32> to vector<8x32xf32>
    %21 = arith.mulf %16, %20 : vector<8x32xf32>
    %22 = vector.broadcast %2 : vector<1x32xf32> to vector<8x32xf32>
    %23 = arith.mulf %21, %22 : vector<8x32xf32>
    %24 = vector.broadcast %3 : vector<1x32xf32> to vector<8x32xf32>
    %25 = arith.addf %23, %24 : vector<8x32xf32>
    %c0_10 = arith.constant 0 : index
    %c0_11 = arith.constant 0 : index
    %c0_12 = arith.constant 0 : index
    %26 = vector.load %arg2[%c0_10, %c0_11, %c0_12] : memref<1x1x8xf32, #tpu.memory_space<vmem>>, vector<1x1x8xf32>
    %cst_13 = arith.constant 1.000000e+00 : f32
    %27 = vector.broadcast %cst_13 : f32 to vector<1x1x8xf32>
    %28 = arith.subf %27, %26 : vector<1x1x8xf32>
    %cst_14 = arith.constant -1.000000e+09 : f32
    %29 = vector.broadcast %cst_14 : f32 to vector<1x1x8xf32>
    %30 = arith.mulf %28, %29 : vector<1x1x8xf32>
    %31 = arith.truncf %25 : vector<8x32xf32> to vector<8x32xbf16>
    %c0_15 = arith.constant 0 : index
    %c0_16 = arith.constant 0 : index
    %c0_17 = arith.constant 0 : index
    %32 = vector.load %arg5[%c0_15, %c0_16, %c0_17] : memref<2x32x96xbf16, #tpu.memory_space<vmem>>, vector<1x32x96xbf16>
    %33 = vector.shape_cast %32 : vector<1x32x96xbf16> to vector<32x96xbf16>
    %cst_18 = arith.constant dense<0.000000e+00> : vector<8x96xf32>
    %34 = tpu.matmul %31, %33, %cst_18 {dimension_numbers = #tpu.dot_dimension_numbers<[1], [0], [0], [1], [0, 0, 1, 1], [], []>} : vector<8x32xbf16>, vector<32x96xbf16>, vector<8x96xf32> -> vector<8x96xf32>
    %c0_19 = arith.constant 0 : index
    %c0_20 = arith.constant 0 : index
    %c0_21 = arith.constant 0 : index
    %35 = vector.load %arg6[%c0_19, %c0_20, %c0_21] : memref<2x1x96xf32, #tpu.memory_space<vmem>>, vector<1x1x96xf32>
    %36 = vector.shape_cast %35 : vector<1x1x96xf32> to vector<1x96xf32>
    %37 = vector.broadcast %36 : vector<1x96xf32> to vector<8x96xf32>
    %38 = arith.addf %34, %37 : vector<8x96xf32>
    %39 = vector.extract_strided_slice %38 {offsets = [0, 0], sizes = [8, 16], strides = [1, 1]} : vector<8x96xf32> to vector<8x16xf32>
    %cst_22 = arith.constant 2.500000e-01 : f32
    %40 = vector.broadcast %cst_22 : f32 to vector<8x16xf32>
    %41 = arith.mulf %39, %40 : vector<8x16xf32>
    %42 = vector.shape_cast %41 : vector<8x16xf32> to vector<1x8x16xf32>
    %43 = vector.extract_strided_slice %38 {offsets = [0, 32], sizes = [8, 16], strides = [1, 1]} : vector<8x96xf32> to vector<8x16xf32>
    %44 = vector.shape_cast %43 : vector<8x16xf32> to vector<1x8x16xf32>
    %45 = vector.extract_strided_slice %38 {offsets = [0, 64], sizes = [8, 16], strides = [1, 1]} : vector<8x96xf32> to vector<8x16xf32>
    %46 = vector.shape_cast %45 : vector<8x16xf32> to vector<1x8x16xf32>
    %47 = arith.truncf %42 : vector<1x8x16xf32> to vector<1x8x16xbf16>
    %48 = arith.truncf %44 : vector<1x8x16xf32> to vector<1x8x16xbf16>
    "tpu.trace_start"() <{level = 10 : i32, message = "bqd,bkd->bqk"}> : () -> ()
    %cst_23 = arith.constant dense<0.000000e+00> : vector<1x8x8xf32>
    %49 = tpu.matmul %47, %48, %cst_23 {dimension_numbers = #tpu.dot_dimension_numbers<[2], [2], [1], [1], [0, 0, 0, 1, 1, 1], [0], [0]>} : vector<1x8x16xbf16>, vector<1x8x16xbf16>, vector<1x8x8xf32> -> vector<1x8x8xf32>
    "tpu.trace_stop"() : () -> ()
    %50 = vector.broadcast %30 : vector<1x1x8xf32> to vector<1x8x8xf32>
    %51 = arith.addf %49, %50 : vector<1x8x8xf32>
    %cst_24 = arith.constant dense<0xFF800000> : vector<1x8xf32>
    %52 = vector.multi_reduction <maximumf>, %51, %cst_24 [2] : vector<1x8x8xf32> to vector<1x8xf32>
    %53 = vector.shape_cast %52 : vector<1x8xf32> to vector<1x8x1xf32>
    %54 = vector.broadcast %53 : vector<1x8x1xf32> to vector<1x8x8xf32>
    %55 = arith.subf %51, %54 : vector<1x8x8xf32>
    %56 = math.exp %55 : vector<1x8x8xf32>
    %cst_25 = arith.constant dense<0.000000e+00> : vector<1x8xf32>
    %57 = vector.multi_reduction <add>, %56, %cst_25 [2] : vector<1x8x8xf32> to vector<1x8xf32>
    %58 = vector.shape_cast %57 : vector<1x8xf32> to vector<1x8x1xf32>
    %59 = vector.broadcast %58 : vector<1x8x1xf32> to vector<1x8x8xf32>
    %60 = arith.divf %56, %59 : vector<1x8x8xf32>
    %61 = arith.truncf %60 : vector<1x8x8xf32> to vector<1x8x8xbf16>
    %62 = arith.truncf %46 : vector<1x8x16xf32> to vector<1x8x16xbf16>
    "tpu.trace_start"() <{level = 10 : i32, message = "bqk,bkd->bqd"}> : () -> ()
    %cst_26 = arith.constant dense<0.000000e+00> : vector<1x8x16xf32>
    %63 = tpu.matmul %61, %62, %cst_26 {dimension_numbers = #tpu.dot_dimension_numbers<[2], [1], [1], [2], [0, 0, 0, 1, 1, 2], [0], [0]>} : vector<1x8x8xbf16>, vector<1x8x16xbf16>, vector<1x8x16xf32> -> vector<1x8x16xf32>
    "tpu.trace_stop"() : () -> ()
    %64 = vector.shape_cast %63 : vector<1x8x16xf32> to vector<8x16xf32>
    %65 = vector.extract_strided_slice %38 {offsets = [0, 16], sizes = [8, 16], strides = [1, 1]} : vector<8x96xf32> to vector<8x16xf32>
    %cst_27 = arith.constant 2.500000e-01 : f32
    %66 = vector.broadcast %cst_27 : f32 to vector<8x16xf32>
    %67 = arith.mulf %65, %66 : vector<8x16xf32>
    %68 = vector.shape_cast %67 : vector<8x16xf32> to vector<1x8x16xf32>
    %69 = vector.extract_strided_slice %38 {offsets = [0, 48], sizes = [8, 16], strides = [1, 1]} : vector<8x96xf32> to vector<8x16xf32>
    %70 = vector.shape_cast %69 : vector<8x16xf32> to vector<1x8x16xf32>
    %71 = vector.extract_strided_slice %38 {offsets = [0, 80], sizes = [8, 16], strides = [1, 1]} : vector<8x96xf32> to vector<8x16xf32>
    %72 = vector.shape_cast %71 : vector<8x16xf32> to vector<1x8x16xf32>
    %73 = arith.truncf %68 : vector<1x8x16xf32> to vector<1x8x16xbf16>
    %74 = arith.truncf %70 : vector<1x8x16xf32> to vector<1x8x16xbf16>
    "tpu.trace_start"() <{level = 10 : i32, message = "bqd,bkd->bqk"}> : () -> ()
    %cst_28 = arith.constant dense<0.000000e+00> : vector<1x8x8xf32>
    %75 = tpu.matmul %73, %74, %cst_28 {dimension_numbers = #tpu.dot_dimension_numbers<[2], [2], [1], [1], [0, 0, 0, 1, 1, 1], [0], [0]>} : vector<1x8x16xbf16>, vector<1x8x16xbf16>, vector<1x8x8xf32> -> vector<1x8x8xf32>
    "tpu.trace_stop"() : () -> ()
    %76 = vector.broadcast %30 : vector<1x1x8xf32> to vector<1x8x8xf32>
    %77 = arith.addf %75, %76 : vector<1x8x8xf32>
    %cst_29 = arith.constant dense<0xFF800000> : vector<1x8xf32>
    %78 = vector.multi_reduction <maximumf>, %77, %cst_29 [2] : vector<1x8x8xf32> to vector<1x8xf32>
    %79 = vector.shape_cast %78 : vector<1x8xf32> to vector<1x8x1xf32>
    %80 = vector.broadcast %79 : vector<1x8x1xf32> to vector<1x8x8xf32>
    %81 = arith.subf %77, %80 : vector<1x8x8xf32>
    %82 = math.exp %81 : vector<1x8x8xf32>
    %cst_30 = arith.constant dense<0.000000e+00> : vector<1x8xf32>
    %83 = vector.multi_reduction <add>, %82, %cst_30 [2] : vector<1x8x8xf32> to vector<1x8xf32>
    %84 = vector.shape_cast %83 : vector<1x8xf32> to vector<1x8x1xf32>
    %85 = vector.broadcast %84 : vector<1x8x1xf32> to vector<1x8x8xf32>
    %86 = arith.divf %82, %85 : vector<1x8x8xf32>
    %87 = arith.truncf %86 : vector<1x8x8xf32> to vector<1x8x8xbf16>
    %88 = arith.truncf %72 : vector<1x8x16xf32> to vector<1x8x16xbf16>
    "tpu.trace_start"() <{level = 10 : i32, message = "bqk,bkd->bqd"}> : () -> ()
    %cst_31 = arith.constant dense<0.000000e+00> : vector<1x8x16xf32>
    %89 = tpu.matmul %87, %88, %cst_31 {dimension_numbers = #tpu.dot_dimension_numbers<[2], [1], [1], [2], [0, 0, 0, 1, 1, 2], [0], [0]>} : vector<1x8x8xbf16>, vector<1x8x16xbf16>, vector<1x8x16xf32> -> vector<1x8x16xf32>
    "tpu.trace_stop"() : () -> ()
    %90 = vector.shape_cast %89 : vector<1x8x16xf32> to vector<8x16xf32>
    %91 = tpu.concatenate %64, %90 in 1 : vector<8x16xf32>, vector<8x16xf32> -> vector<8x32xf32>
    %92 = arith.truncf %91 : vector<8x32xf32> to vector<8x32xbf16>
    %c0_32 = arith.constant 0 : index
    %c0_33 = arith.constant 0 : index
    %c0_34 = arith.constant 0 : index
    %93 = vector.load %arg7[%c0_32, %c0_33, %c0_34] : memref<2x32x32xbf16, #tpu.memory_space<vmem>>, vector<1x32x32xbf16>
    %94 = vector.shape_cast %93 : vector<1x32x32xbf16> to vector<32x32xbf16>
    %cst_35 = arith.constant dense<0.000000e+00> : vector<8x32xf32>
    %95 = tpu.matmul %92, %94, %cst_35 {dimension_numbers = #tpu.dot_dimension_numbers<[1], [0], [0], [1], [0, 0, 1, 1], [], []>} : vector<8x32xbf16>, vector<32x32xbf16>, vector<8x32xf32> -> vector<8x32xf32>
    %c0_36 = arith.constant 0 : index
    %c0_37 = arith.constant 0 : index
    %c0_38 = arith.constant 0 : index
    %96 = vector.load %arg8[%c0_36, %c0_37, %c0_38] : memref<2x1x32xf32, #tpu.memory_space<vmem>>, vector<1x1x32xf32>
    %97 = vector.shape_cast %96 : vector<1x1x32xf32> to vector<1x32xf32>
    %98 = vector.broadcast %97 : vector<1x32xf32> to vector<8x32xf32>
    %99 = arith.addf %95, %98 : vector<8x32xf32>
    %100 = arith.addf %99, %25 : vector<8x32xf32>
    %c0_39 = arith.constant 0 : index
    %c0_40 = arith.constant 0 : index
    %c0_41 = arith.constant 0 : index
    %101 = vector.load %arg9[%c0_39, %c0_40, %c0_41] : memref<2x1x32xf32, #tpu.memory_space<vmem>>, vector<1x1x32xf32>
    %102 = vector.shape_cast %101 : vector<1x1x32xf32> to vector<1x32xf32>
    %c0_42 = arith.constant 0 : index
    %c0_43 = arith.constant 0 : index
    %c0_44 = arith.constant 0 : index
    %103 = vector.load %arg10[%c0_42, %c0_43, %c0_44] : memref<2x1x32xf32, #tpu.memory_space<vmem>>, vector<1x1x32xf32>
    %104 = vector.shape_cast %103 : vector<1x1x32xf32> to vector<1x32xf32>
    %cst_45 = arith.constant dense<0.000000e+00> : vector<8xf32>
    %105 = vector.multi_reduction <add>, %100, %cst_45 [1] : vector<8x32xf32> to vector<8xf32>
    %106 = vector.shape_cast %105 : vector<8xf32> to vector<8x1xf32>
    %cst_46 = arith.constant 3.200000e+01 : f32
    %107 = vector.broadcast %cst_46 : f32 to vector<8x1xf32>
    %108 = arith.divf %106, %107 : vector<8x1xf32>
    %109 = vector.broadcast %108 : vector<8x1xf32> to vector<8x32xf32>
    %110 = arith.subf %100, %109 : vector<8x32xf32>
    %111 = arith.mulf %110, %110 : vector<8x32xf32>
    %cst_47 = arith.constant dense<0.000000e+00> : vector<8xf32>
    %112 = vector.multi_reduction <add>, %111, %cst_47 [1] : vector<8x32xf32> to vector<8xf32>
    %113 = vector.shape_cast %112 : vector<8xf32> to vector<8x1xf32>
    %cst_48 = arith.constant 3.200000e+01 : f32
    %114 = vector.broadcast %cst_48 : f32 to vector<8x1xf32>
    %115 = arith.divf %113, %114 : vector<8x1xf32>
    %116 = vector.broadcast %108 : vector<8x1xf32> to vector<8x32xf32>
    %117 = arith.subf %100, %116 : vector<8x32xf32>
    %cst_49 = arith.constant 9.99999974E-6 : f32
    %118 = vector.broadcast %cst_49 : f32 to vector<8x1xf32>
    %119 = arith.addf %115, %118 : vector<8x1xf32>
    %120 = math.rsqrt %119 : vector<8x1xf32>
    %121 = vector.broadcast %120 : vector<8x1xf32> to vector<8x32xf32>
    %122 = arith.mulf %117, %121 : vector<8x32xf32>
    %123 = vector.broadcast %102 : vector<1x32xf32> to vector<8x32xf32>
    %124 = arith.mulf %122, %123 : vector<8x32xf32>
    %125 = vector.broadcast %104 : vector<1x32xf32> to vector<8x32xf32>
    %126 = arith.addf %124, %125 : vector<8x32xf32>
    %127 = arith.truncf %126 : vector<8x32xf32> to vector<8x32xbf16>
    %c0_50 = arith.constant 0 : index
    %c0_51 = arith.constant 0 : index
    %c0_52 = arith.constant 0 : index
    %128 = vector.load %arg11[%c0_50, %c0_51, %c0_52] : memref<2x32x64xbf16, #tpu.memory_space<vmem>>, vector<1x32x64xbf16>
    %129 = vector.shape_cast %128 : vector<1x32x64xbf16> to vector<32x64xbf16>
    %cst_53 = arith.constant dense<0.000000e+00> : vector<8x64xf32>
    %130 = tpu.matmul %127, %129, %cst_53 {dimension_numbers = #tpu.dot_dimension_numbers<[1], [0], [0], [1], [0, 0, 1, 1], [], []>} : vector<8x32xbf16>, vector<32x64xbf16>, vector<8x64xf32> -> vector<8x64xf32>
    %c0_54 = arith.constant 0 : index
    %c0_55 = arith.constant 0 : index
    %c0_56 = arith.constant 0 : index
    %131 = vector.load %arg12[%c0_54, %c0_55, %c0_56] : memref<2x1x64xf32, #tpu.memory_space<vmem>>, vector<1x1x64xf32>
    %132 = vector.shape_cast %131 : vector<1x1x64xf32> to vector<1x64xf32>
    %133 = vector.broadcast %132 : vector<1x64xf32> to vector<8x64xf32>
    %134 = arith.addf %130, %133 : vector<8x64xf32>
    %cst_57 = arith.constant 5.000000e-01 : f32
    %135 = vector.broadcast %cst_57 : f32 to vector<8x64xf32>
    %136 = arith.mulf %135, %134 : vector<8x64xf32>
    %cst_58 = arith.constant 4.471500e-02 : f32
    %137 = vector.broadcast %cst_58 : f32 to vector<8x64xf32>
    %138 = arith.mulf %137, %134 : vector<8x64xf32>
    %139 = arith.mulf %138, %134 : vector<8x64xf32>
    %140 = arith.mulf %139, %134 : vector<8x64xf32>
    %141 = arith.addf %134, %140 : vector<8x64xf32>
    %cst_59 = arith.constant 0.797884583 : f32
    %142 = vector.broadcast %cst_59 : f32 to vector<8x64xf32>
    %143 = arith.mulf %142, %141 : vector<8x64xf32>
    %144 = math.tanh %143 : vector<8x64xf32>
    %cst_60 = arith.constant 1.000000e+00 : f32
    %145 = vector.broadcast %cst_60 : f32 to vector<8x64xf32>
    %146 = arith.addf %145, %144 : vector<8x64xf32>
    %147 = arith.mulf %136, %146 : vector<8x64xf32>
    %148 = arith.truncf %147 : vector<8x64xf32> to vector<8x64xbf16>
    %c0_61 = arith.constant 0 : index
    %c0_62 = arith.constant 0 : index
    %c0_63 = arith.constant 0 : index
    %149 = vector.load %arg13[%c0_61, %c0_62, %c0_63] : memref<2x64x32xbf16, #tpu.memory_space<vmem>>, vector<1x64x32xbf16>
    %150 = vector.shape_cast %149 : vector<1x64x32xbf16> to vector<64x32xbf16>
    %cst_64 = arith.constant dense<0.000000e+00> : vector<8x32xf32>
    %151 = tpu.matmul %148, %150, %cst_64 {dimension_numbers = #tpu.dot_dimension_numbers<[1], [0], [0], [1], [0, 0, 1, 1], [], []>} : vector<8x64xbf16>, vector<64x32xbf16>, vector<8x32xf32> -> vector<8x32xf32>
    %c0_65 = arith.constant 0 : index
    %c0_66 = arith.constant 0 : index
    %c0_67 = arith.constant 0 : index
    %152 = vector.load %arg14[%c0_65, %c0_66, %c0_67] : memref<2x1x32xf32, #tpu.memory_space<vmem>>, vector<1x1x32xf32>
    %153 = vector.shape_cast %152 : vector<1x1x32xf32> to vector<1x32xf32>
    %154 = vector.broadcast %153 : vector<1x32xf32> to vector<8x32xf32>
    %155 = arith.addf %151, %154 : vector<8x32xf32>
    %156 = arith.addf %155, %126 : vector<8x32xf32>
    %c0_68 = arith.constant 0 : index
    %c0_69 = arith.constant 0 : index
    %c0_70 = arith.constant 0 : index
    %157 = vector.load %arg15[%c0_68, %c0_69, %c0_70] : memref<2x1x32xf32, #tpu.memory_space<vmem>>, vector<1x1x32xf32>
    %158 = vector.shape_cast %157 : vector<1x1x32xf32> to vector<1x32xf32>
    %c0_71 = arith.constant 0 : index
    %c0_72 = arith.constant 0 : index
    %c0_73 = arith.constant 0 : index
    %159 = vector.load %arg16[%c0_71, %c0_72, %c0_73] : memref<2x1x32xf32, #tpu.memory_space<vmem>>, vector<1x1x32xf32>
    %160 = vector.shape_cast %159 : vector<1x1x32xf32> to vector<1x32xf32>
    %cst_74 = arith.constant dense<0.000000e+00> : vector<8xf32>
    %161 = vector.multi_reduction <add>, %156, %cst_74 [1] : vector<8x32xf32> to vector<8xf32>
    %162 = vector.shape_cast %161 : vector<8xf32> to vector<8x1xf32>
    %cst_75 = arith.constant 3.200000e+01 : f32
    %163 = vector.broadcast %cst_75 : f32 to vector<8x1xf32>
    %164 = arith.divf %162, %163 : vector<8x1xf32>
    %165 = vector.broadcast %164 : vector<8x1xf32> to vector<8x32xf32>
    %166 = arith.subf %156, %165 : vector<8x32xf32>
    %167 = arith.mulf %166, %166 : vector<8x32xf32>
    %cst_76 = arith.constant dense<0.000000e+00> : vector<8xf32>
    %168 = vector.multi_reduction <add>, %167, %cst_76 [1] : vector<8x32xf32> to vector<8xf32>
    %169 = vector.shape_cast %168 : vector<8xf32> to vector<8x1xf32>
    %cst_77 = arith.constant 3.200000e+01 : f32
    %170 = vector.broadcast %cst_77 : f32 to vector<8x1xf32>
    %171 = arith.divf %169, %170 : vector<8x1xf32>
    %172 = vector.broadcast %164 : vector<8x1xf32> to vector<8x32xf32>
    %173 = arith.subf %156, %172 : vector<8x32xf32>
    %cst_78 = arith.constant 9.99999974E-6 : f32
    %174 = vector.broadcast %cst_78 : f32 to vector<8x1xf32>
    %175 = arith.addf %171, %174 : vector<8x1xf32>
    %176 = math.rsqrt %175 : vector<8x1xf32>
    %177 = vector.broadcast %176 : vector<8x1xf32> to vector<8x32xf32>
    %178 = arith.mulf %173, %177 : vector<8x32xf32>
    %179 = vector.broadcast %158 : vector<1x32xf32> to vector<8x32xf32>
    %180 = arith.mulf %178, %179 : vector<8x32xf32>
    %181 = vector.broadcast %160 : vector<1x32xf32> to vector<8x32xf32>
    %182 = arith.addf %180, %181 : vector<8x32xf32>
    %183 = arith.truncf %182 : vector<8x32xf32> to vector<8x32xbf16>
    %c1 = arith.constant 1 : index
    %c0_79 = arith.constant 0 : index
    %c0_80 = arith.constant 0 : index
    %184 = vector.load %arg5[%c1, %c0_79, %c0_80] : memref<2x32x96xbf16, #tpu.memory_space<vmem>>, vector<1x32x96xbf16>
    %185 = vector.shape_cast %184 : vector<1x32x96xbf16> to vector<32x96xbf16>
    %cst_81 = arith.constant dense<0.000000e+00> : vector<8x96xf32>
    %186 = tpu.matmul %183, %185, %cst_81 {dimension_numbers = #tpu.dot_dimension_numbers<[1], [0], [0], [1], [0, 0, 1, 1], [], []>} : vector<8x32xbf16>, vector<32x96xbf16>, vector<8x96xf32> -> vector<8x96xf32>
    %c1_82 = arith.constant 1 : index
    %c0_83 = arith.constant 0 : index
    %c0_84 = arith.constant 0 : index
    %187 = vector.load %arg6[%c1_82, %c0_83, %c0_84] : memref<2x1x96xf32, #tpu.memory_space<vmem>>, vector<1x1x96xf32>
    %188 = vector.shape_cast %187 : vector<1x1x96xf32> to vector<1x96xf32>
    %189 = vector.broadcast %188 : vector<1x96xf32> to vector<8x96xf32>
    %190 = arith.addf %186, %189 : vector<8x96xf32>
    %191 = vector.extract_strided_slice %190 {offsets = [0, 0], sizes = [8, 16], strides = [1, 1]} : vector<8x96xf32> to vector<8x16xf32>
    %cst_85 = arith.constant 2.500000e-01 : f32
    %192 = vector.broadcast %cst_85 : f32 to vector<8x16xf32>
    %193 = arith.mulf %191, %192 : vector<8x16xf32>
    %194 = vector.shape_cast %193 : vector<8x16xf32> to vector<1x8x16xf32>
    %195 = vector.extract_strided_slice %190 {offsets = [0, 32], sizes = [8, 16], strides = [1, 1]} : vector<8x96xf32> to vector<8x16xf32>
    %196 = vector.shape_cast %195 : vector<8x16xf32> to vector<1x8x16xf32>
    %197 = vector.extract_strided_slice %190 {offsets = [0, 64], sizes = [8, 16], strides = [1, 1]} : vector<8x96xf32> to vector<8x16xf32>
    %198 = vector.shape_cast %197 : vector<8x16xf32> to vector<1x8x16xf32>
    %199 = arith.truncf %194 : vector<1x8x16xf32> to vector<1x8x16xbf16>
    %200 = arith.truncf %196 : vector<1x8x16xf32> to vector<1x8x16xbf16>
    "tpu.trace_start"() <{level = 10 : i32, message = "bqd,bkd->bqk"}> : () -> ()
    %cst_86 = arith.constant dense<0.000000e+00> : vector<1x8x8xf32>
    %201 = tpu.matmul %199, %200, %cst_86 {dimension_numbers = #tpu.dot_dimension_numbers<[2], [2], [1], [1], [0, 0, 0, 1, 1, 1], [0], [0]>} : vector<1x8x16xbf16>, vector<1x8x16xbf16>, vector<1x8x8xf32> -> vector<1x8x8xf32>
    "tpu.trace_stop"() : () -> ()
    %202 = vector.broadcast %30 : vector<1x1x8xf32> to vector<1x8x8xf32>
    %203 = arith.addf %201, %202 : vector<1x8x8xf32>
    %cst_87 = arith.constant dense<0xFF800000> : vector<1x8xf32>
    %204 = vector.multi_reduction <maximumf>, %203, %cst_87 [2] : vector<1x8x8xf32> to vector<1x8xf32>
    %205 = vector.shape_cast %204 : vector<1x8xf32> to vector<1x8x1xf32>
    %206 = vector.broadcast %205 : vector<1x8x1xf32> to vector<1x8x8xf32>
    %207 = arith.subf %203, %206 : vector<1x8x8xf32>
    %208 = math.exp %207 : vector<1x8x8xf32>
    %cst_88 = arith.constant dense<0.000000e+00> : vector<1x8xf32>
    %209 = vector.multi_reduction <add>, %208, %cst_88 [2] : vector<1x8x8xf32> to vector<1x8xf32>
    %210 = vector.shape_cast %209 : vector<1x8xf32> to vector<1x8x1xf32>
    %211 = vector.broadcast %210 : vector<1x8x1xf32> to vector<1x8x8xf32>
    %212 = arith.divf %208, %211 : vector<1x8x8xf32>
    %213 = arith.truncf %212 : vector<1x8x8xf32> to vector<1x8x8xbf16>
    %214 = arith.truncf %198 : vector<1x8x16xf32> to vector<1x8x16xbf16>
    "tpu.trace_start"() <{level = 10 : i32, message = "bqk,bkd->bqd"}> : () -> ()
    %cst_89 = arith.constant dense<0.000000e+00> : vector<1x8x16xf32>
    %215 = tpu.matmul %213, %214, %cst_89 {dimension_numbers = #tpu.dot_dimension_numbers<[2], [1], [1], [2], [0, 0, 0, 1, 1, 2], [0], [0]>} : vector<1x8x8xbf16>, vector<1x8x16xbf16>, vector<1x8x16xf32> -> vector<1x8x16xf32>
    "tpu.trace_stop"() : () -> ()
    %216 = vector.shape_cast %215 : vector<1x8x16xf32> to vector<8x16xf32>
    %217 = vector.extract_strided_slice %190 {offsets = [0, 16], sizes = [8, 16], strides = [1, 1]} : vector<8x96xf32> to vector<8x16xf32>
    %cst_90 = arith.constant 2.500000e-01 : f32
    %218 = vector.broadcast %cst_90 : f32 to vector<8x16xf32>
    %219 = arith.mulf %217, %218 : vector<8x16xf32>
    %220 = vector.shape_cast %219 : vector<8x16xf32> to vector<1x8x16xf32>
    %221 = vector.extract_strided_slice %190 {offsets = [0, 48], sizes = [8, 16], strides = [1, 1]} : vector<8x96xf32> to vector<8x16xf32>
    %222 = vector.shape_cast %221 : vector<8x16xf32> to vector<1x8x16xf32>
    %223 = vector.extract_strided_slice %190 {offsets = [0, 80], sizes = [8, 16], strides = [1, 1]} : vector<8x96xf32> to vector<8x16xf32>
    %224 = vector.shape_cast %223 : vector<8x16xf32> to vector<1x8x16xf32>
    %225 = arith.truncf %220 : vector<1x8x16xf32> to vector<1x8x16xbf16>
    %226 = arith.truncf %222 : vector<1x8x16xf32> to vector<1x8x16xbf16>
    "tpu.trace_start"() <{level = 10 : i32, message = "bqd,bkd->bqk"}> : () -> ()
    %cst_91 = arith.constant dense<0.000000e+00> : vector<1x8x8xf32>
    %227 = tpu.matmul %225, %226, %cst_91 {dimension_numbers = #tpu.dot_dimension_numbers<[2], [2], [1], [1], [0, 0, 0, 1, 1, 1], [0], [0]>} : vector<1x8x16xbf16>, vector<1x8x16xbf16>, vector<1x8x8xf32> -> vector<1x8x8xf32>
    "tpu.trace_stop"() : () -> ()
    %228 = vector.broadcast %30 : vector<1x1x8xf32> to vector<1x8x8xf32>
    %229 = arith.addf %227, %228 : vector<1x8x8xf32>
    %cst_92 = arith.constant dense<0xFF800000> : vector<1x8xf32>
    %230 = vector.multi_reduction <maximumf>, %229, %cst_92 [2] : vector<1x8x8xf32> to vector<1x8xf32>
    %231 = vector.shape_cast %230 : vector<1x8xf32> to vector<1x8x1xf32>
    %232 = vector.broadcast %231 : vector<1x8x1xf32> to vector<1x8x8xf32>
    %233 = arith.subf %229, %232 : vector<1x8x8xf32>
    %234 = math.exp %233 : vector<1x8x8xf32>
    %cst_93 = arith.constant dense<0.000000e+00> : vector<1x8xf32>
    %235 = vector.multi_reduction <add>, %234, %cst_93 [2] : vector<1x8x8xf32> to vector<1x8xf32>
    %236 = vector.shape_cast %235 : vector<1x8xf32> to vector<1x8x1xf32>
    %237 = vector.broadcast %236 : vector<1x8x1xf32> to vector<1x8x8xf32>
    %238 = arith.divf %234, %237 : vector<1x8x8xf32>
    %239 = arith.truncf %238 : vector<1x8x8xf32> to vector<1x8x8xbf16>
    %240 = arith.truncf %224 : vector<1x8x16xf32> to vector<1x8x16xbf16>
    "tpu.trace_start"() <{level = 10 : i32, message = "bqk,bkd->bqd"}> : () -> ()
    %cst_94 = arith.constant dense<0.000000e+00> : vector<1x8x16xf32>
    %241 = tpu.matmul %239, %240, %cst_94 {dimension_numbers = #tpu.dot_dimension_numbers<[2], [1], [1], [2], [0, 0, 0, 1, 1, 2], [0], [0]>} : vector<1x8x8xbf16>, vector<1x8x16xbf16>, vector<1x8x16xf32> -> vector<1x8x16xf32>
    "tpu.trace_stop"() : () -> ()
    %242 = vector.shape_cast %241 : vector<1x8x16xf32> to vector<8x16xf32>
    %243 = tpu.concatenate %216, %242 in 1 : vector<8x16xf32>, vector<8x16xf32> -> vector<8x32xf32>
    %244 = arith.truncf %243 : vector<8x32xf32> to vector<8x32xbf16>
    %c1_95 = arith.constant 1 : index
    %c0_96 = arith.constant 0 : index
    %c0_97 = arith.constant 0 : index
    %245 = vector.load %arg7[%c1_95, %c0_96, %c0_97] : memref<2x32x32xbf16, #tpu.memory_space<vmem>>, vector<1x32x32xbf16>
    %246 = vector.shape_cast %245 : vector<1x32x32xbf16> to vector<32x32xbf16>
    %cst_98 = arith.constant dense<0.000000e+00> : vector<8x32xf32>
    %247 = tpu.matmul %244, %246, %cst_98 {dimension_numbers = #tpu.dot_dimension_numbers<[1], [0], [0], [1], [0, 0, 1, 1], [], []>} : vector<8x32xbf16>, vector<32x32xbf16>, vector<8x32xf32> -> vector<8x32xf32>
    %c1_99 = arith.constant 1 : index
    %c0_100 = arith.constant 0 : index
    %c0_101 = arith.constant 0 : index
    %248 = vector.load %arg8[%c1_99, %c0_100, %c0_101] : memref<2x1x32xf32, #tpu.memory_space<vmem>>, vector<1x1x32xf32>
    %249 = vector.shape_cast %248 : vector<1x1x32xf32> to vector<1x32xf32>
    %250 = vector.broadcast %249 : vector<1x32xf32> to vector<8x32xf32>
    %251 = arith.addf %247, %250 : vector<8x32xf32>
    %252 = arith.addf %251, %182 : vector<8x32xf32>
    %c1_102 = arith.constant 1 : index
    %c0_103 = arith.constant 0 : index
    %c0_104 = arith.constant 0 : index
    %253 = vector.load %arg9[%c1_102, %c0_103, %c0_104] : memref<2x1x32xf32, #tpu.memory_space<vmem>>, vector<1x1x32xf32>
    %254 = vector.shape_cast %253 : vector<1x1x32xf32> to vector<1x32xf32>
    %c1_105 = arith.constant 1 : index
    %c0_106 = arith.constant 0 : index
    %c0_107 = arith.constant 0 : index
    %255 = vector.load %arg10[%c1_105, %c0_106, %c0_107] : memref<2x1x32xf32, #tpu.memory_space<vmem>>, vector<1x1x32xf32>
    %256 = vector.shape_cast %255 : vector<1x1x32xf32> to vector<1x32xf32>
    %cst_108 = arith.constant dense<0.000000e+00> : vector<8xf32>
    %257 = vector.multi_reduction <add>, %252, %cst_108 [1] : vector<8x32xf32> to vector<8xf32>
    %258 = vector.shape_cast %257 : vector<8xf32> to vector<8x1xf32>
    %cst_109 = arith.constant 3.200000e+01 : f32
    %259 = vector.broadcast %cst_109 : f32 to vector<8x1xf32>
    %260 = arith.divf %258, %259 : vector<8x1xf32>
    %261 = vector.broadcast %260 : vector<8x1xf32> to vector<8x32xf32>
    %262 = arith.subf %252, %261 : vector<8x32xf32>
    %263 = arith.mulf %262, %262 : vector<8x32xf32>
    %cst_110 = arith.constant dense<0.000000e+00> : vector<8xf32>
    %264 = vector.multi_reduction <add>, %263, %cst_110 [1] : vector<8x32xf32> to vector<8xf32>
    %265 = vector.shape_cast %264 : vector<8xf32> to vector<8x1xf32>
    %cst_111 = arith.constant 3.200000e+01 : f32
    %266 = vector.broadcast %cst_111 : f32 to vector<8x1xf32>
    %267 = arith.divf %265, %266 : vector<8x1xf32>
    %268 = vector.broadcast %260 : vector<8x1xf32> to vector<8x32xf32>
    %269 = arith.subf %252, %268 : vector<8x32xf32>
    %cst_112 = arith.constant 9.99999974E-6 : f32
    %270 = vector.broadcast %cst_112 : f32 to vector<8x1xf32>
    %271 = arith.addf %267, %270 : vector<8x1xf32>
    %272 = math.rsqrt %271 : vector<8x1xf32>
    %273 = vector.broadcast %272 : vector<8x1xf32> to vector<8x32xf32>
    %274 = arith.mulf %269, %273 : vector<8x32xf32>
    %275 = vector.broadcast %254 : vector<1x32xf32> to vector<8x32xf32>
    %276 = arith.mulf %274, %275 : vector<8x32xf32>
    %277 = vector.broadcast %256 : vector<1x32xf32> to vector<8x32xf32>
    %278 = arith.addf %276, %277 : vector<8x32xf32>
    %279 = arith.truncf %278 : vector<8x32xf32> to vector<8x32xbf16>
    %c1_113 = arith.constant 1 : index
    %c0_114 = arith.constant 0 : index
    %c0_115 = arith.constant 0 : index
    %280 = vector.load %arg11[%c1_113, %c0_114, %c0_115] : memref<2x32x64xbf16, #tpu.memory_space<vmem>>, vector<1x32x64xbf16>
    %281 = vector.shape_cast %280 : vector<1x32x64xbf16> to vector<32x64xbf16>
    %cst_116 = arith.constant dense<0.000000e+00> : vector<8x64xf32>
    %282 = tpu.matmul %279, %281, %cst_116 {dimension_numbers = #tpu.dot_dimension_numbers<[1], [0], [0], [1], [0, 0, 1, 1], [], []>} : vector<8x32xbf16>, vector<32x64xbf16>, vector<8x64xf32> -> vector<8x64xf32>
    %c1_117 = arith.constant 1 : index
    %c0_118 = arith.constant 0 : index
    %c0_119 = arith.constant 0 : index
    %283 = vector.load %arg12[%c1_117, %c0_118, %c0_119] : memref<2x1x64xf32, #tpu.memory_space<vmem>>, vector<1x1x64xf32>
    %284 = vector.shape_cast %283 : vector<1x1x64xf32> to vector<1x64xf32>
    %285 = vector.broadcast %284 : vector<1x64xf32> to vector<8x64xf32>
    %286 = arith.addf %282, %285 : vector<8x64xf32>
    %cst_120 = arith.constant 5.000000e-01 : f32
    %287 = vector.broadcast %cst_120 : f32 to vector<8x64xf32>
    %288 = arith.mulf %287, %286 : vector<8x64xf32>
    %cst_121 = arith.constant 4.471500e-02 : f32
    %289 = vector.broadcast %cst_121 : f32 to vector<8x64xf32>
    %290 = arith.mulf %289, %286 : vector<8x64xf32>
    %291 = arith.mulf %290, %286 : vector<8x64xf32>
    %292 = arith.mulf %291, %286 : vector<8x64xf32>
    %293 = arith.addf %286, %292 : vector<8x64xf32>
    %cst_122 = arith.constant 0.797884583 : f32
    %294 = vector.broadcast %cst_122 : f32 to vector<8x64xf32>
    %295 = arith.mulf %294, %293 : vector<8x64xf32>
    %296 = math.tanh %295 : vector<8x64xf32>
    %cst_123 = arith.constant 1.000000e+00 : f32
    %297 = vector.broadcast %cst_123 : f32 to vector<8x64xf32>
    %298 = arith.addf %297, %296 : vector<8x64xf32>
    %299 = arith.mulf %288, %298 : vector<8x64xf32>
    %300 = arith.truncf %299 : vector<8x64xf32> to vector<8x64xbf16>
    %c1_124 = arith.constant 1 : index
    %c0_125 = arith.constant 0 : index
    %c0_126 = arith.constant 0 : index
    %301 = vector.load %arg13[%c1_124, %c0_125, %c0_126] : memref<2x64x32xbf16, #tpu.memory_space<vmem>>, vector<1x64x32xbf16>
    %302 = vector.shape_cast %301 : vector<1x64x32xbf16> to vector<64x32xbf16>
    %cst_127 = arith.constant dense<0.000000e+00> : vector<8x32xf32>
    %303 = tpu.matmul %300, %302, %cst_127 {dimension_numbers = #tpu.dot_dimension_numbers<[1], [0], [0], [1], [0, 0, 1, 1], [], []>} : vector<8x64xbf16>, vector<64x32xbf16>, vector<8x32xf32> -> vector<8x32xf32>
    %c1_128 = arith.constant 1 : index
    %c0_129 = arith.constant 0 : index
    %c0_130 = arith.constant 0 : index
    %304 = vector.load %arg14[%c1_128, %c0_129, %c0_130] : memref<2x1x32xf32, #tpu.memory_space<vmem>>, vector<1x1x32xf32>
    %305 = vector.shape_cast %304 : vector<1x1x32xf32> to vector<1x32xf32>
    %306 = vector.broadcast %305 : vector<1x32xf32> to vector<8x32xf32>
    %307 = arith.addf %303, %306 : vector<8x32xf32>
    %308 = arith.addf %307, %278 : vector<8x32xf32>
    %c1_131 = arith.constant 1 : index
    %c0_132 = arith.constant 0 : index
    %c0_133 = arith.constant 0 : index
    %309 = vector.load %arg15[%c1_131, %c0_132, %c0_133] : memref<2x1x32xf32, #tpu.memory_space<vmem>>, vector<1x1x32xf32>
    %310 = vector.shape_cast %309 : vector<1x1x32xf32> to vector<1x32xf32>
    %c1_134 = arith.constant 1 : index
    %c0_135 = arith.constant 0 : index
    %c0_136 = arith.constant 0 : index
    %311 = vector.load %arg16[%c1_134, %c0_135, %c0_136] : memref<2x1x32xf32, #tpu.memory_space<vmem>>, vector<1x1x32xf32>
    %312 = vector.shape_cast %311 : vector<1x1x32xf32> to vector<1x32xf32>
    %cst_137 = arith.constant dense<0.000000e+00> : vector<8xf32>
    %313 = vector.multi_reduction <add>, %308, %cst_137 [1] : vector<8x32xf32> to vector<8xf32>
    %314 = vector.shape_cast %313 : vector<8xf32> to vector<8x1xf32>
    %cst_138 = arith.constant 3.200000e+01 : f32
    %315 = vector.broadcast %cst_138 : f32 to vector<8x1xf32>
    %316 = arith.divf %314, %315 : vector<8x1xf32>
    %317 = vector.broadcast %316 : vector<8x1xf32> to vector<8x32xf32>
    %318 = arith.subf %308, %317 : vector<8x32xf32>
    %319 = arith.mulf %318, %318 : vector<8x32xf32>
    %cst_139 = arith.constant dense<0.000000e+00> : vector<8xf32>
    %320 = vector.multi_reduction <add>, %319, %cst_139 [1] : vector<8x32xf32> to vector<8xf32>
    %321 = vector.shape_cast %320 : vector<8xf32> to vector<8x1xf32>
    %cst_140 = arith.constant 3.200000e+01 : f32
    %322 = vector.broadcast %cst_140 : f32 to vector<8x1xf32>
    %323 = arith.divf %321, %322 : vector<8x1xf32>
    %324 = vector.broadcast %316 : vector<8x1xf32> to vector<8x32xf32>
    %325 = arith.subf %308, %324 : vector<8x32xf32>
    %cst_141 = arith.constant 9.99999974E-6 : f32
    %326 = vector.broadcast %cst_141 : f32 to vector<8x1xf32>
    %327 = arith.addf %323, %326 : vector<8x1xf32>
    %328 = math.rsqrt %327 : vector<8x1xf32>
    %329 = vector.broadcast %328 : vector<8x1xf32> to vector<8x32xf32>
    %330 = arith.mulf %325, %329 : vector<8x32xf32>
    %331 = vector.broadcast %310 : vector<1x32xf32> to vector<8x32xf32>
    %332 = arith.mulf %330, %331 : vector<8x32xf32>
    %333 = vector.broadcast %312 : vector<1x32xf32> to vector<8x32xf32>
    %334 = arith.addf %332, %333 : vector<8x32xf32>
    %335 = vector.shape_cast %334 : vector<8x32xf32> to vector<1x8x32xf32>
    %336 = vector.extract_strided_slice %335 {offsets = [0, 0, 0], sizes = [1, 1, 32], strides = [1, 1, 1]} : vector<1x8x32xf32> to vector<1x1x32xf32>
    %c0_142 = arith.constant 0 : index
    %c0_143 = arith.constant 0 : index
    %c0_144 = arith.constant 0 : index
    %337 = vector.load %arg17[%c0_142, %c0_143, %c0_144] : memref<1x1x32xf32, #tpu.memory_space<vmem>>, vector<1x1x32xf32>
    tpu.vector_store %arg17[%c0_142, %c0_143, %c0_144], %336 {strides = array<i32>} : memref<1x1x32xf32, #tpu.memory_space<vmem>>, vector<1x1x32xf32>,
    return
  }
  func.func @transform_0(%arg0: i32) -> (i32, i32, i32) {
    %c0_i32 = arith.constant 0 : i32
    %c0_i32_0 = arith.constant 0 : i32
    %c0_i32_1 = arith.constant 0 : i32
    return %arg0, %c0_i32, %c0_i32_0 : i32, i32, i32
  }
  func.func @transform_1(%arg0: i32) -> (i32, i32, i32) {
    %c0_i32 = arith.constant 0 : i32
    %c0_i32_0 = arith.constant 0 : i32
    %c0_i32_1 = arith.constant 0 : i32
    return %arg0, %c0_i32, %c0_i32_0 : i32, i32, i32
  }
  func.func @transform_2(%arg0: i32) -> (i32, i32) {
    %c0_i32 = arith.constant 0 : i32
    %c0_i32_0 = arith.constant 0 : i32
    %c0_i32_1 = arith.constant 0 : i32
    return %c0_i32, %c0_i32_0 : i32, i32
  }
  func.func @transform_3(%arg0: i32) -> (i32, i32) {
    %c0_i32 = arith.constant 0 : i32
    %c0_i32_0 = arith.constant 0 : i32
    %c0_i32_1 = arith.constant 0 : i32
    return %c0_i32, %c0_i32_0 : i32, i32
  }
  func.func @transform_4(%arg0: i32) -> (i32, i32, i32) {
    %c0_i32 = arith.constant 0 : i32
    %c0_i32_0 = arith.constant 0 : i32
    %c0_i32_1 = arith.constant 0 : i32
    %c0_i32_2 = arith.constant 0 : i32
    return %c0_i32, %c0_i32_0, %c0_i32_1 : i32, i32, i32
  }
  func.func @transform_5(%arg0: i32) -> (i32, i32, i32) {
    %c0_i32 = arith.constant 0 : i32
    %c0_i32_0 = arith.constant 0 : i32
    %c0_i32_1 = arith.constant 0 : i32
    %c0_i32_2 = arith.constant 0 : i32
    return %c0_i32, %c0_i32_0, %c0_i32_1 : i32, i32, i32
  }
  func.func @transform_6(%arg0: i32) -> (i32, i32, i32) {
    %c0_i32 = arith.constant 0 : i32
    %c0_i32_0 = arith.constant 0 : i32
    %c0_i32_1 = arith.constant 0 : i32
    %c0_i32_2 = arith.constant 0 : i32
    return %c0_i32, %c0_i32_0, %c0_i32_1 : i32, i32, i32
  }
  func.func @transform_7(%arg0: i32) -> (i32, i32, i32) {
    %c0_i32 = arith.constant 0 : i32
    %c0_i32_0 = arith.constant 0 : i32
    %c0_i32_1 = arith.constant 0 : i32
    %c0_i32_2 = arith.constant 0 : i32
    return %c0_i32, %c0_i32_0, %c0_i32_1 : i32, i32, i32
  }
  func.func @transform_8(%arg0: i32) -> (i32, i32, i32) {
    %c0_i32 = arith.constant 0 : i32
    %c0_i32_0 = arith.constant 0 : i32
    %c0_i32_1 = arith.constant 0 : i32
    %c0_i32_2 = arith.constant 0 : i32
    return %c0_i32, %c0_i32_0, %c0_i32_1 : i32, i32, i32
  }
  func.func @transform_9(%arg0: i32) -> (i32, i32, i32) {
    %c0_i32 = arith.constant 0 : i32
    %c0_i32_0 = arith.constant 0 : i32
    %c0_i32_1 = arith.constant 0 : i32
    %c0_i32_2 = arith.constant 0 : i32
    return %c0_i32, %c0_i32_0, %c0_i32_1 : i32, i32, i32
  }
  func.func @transform_10(%arg0: i32) -> (i32, i32, i32) {
    %c0_i32 = arith.constant 0 : i32
    %c0_i32_0 = arith.constant 0 : i32
    %c0_i32_1 = arith.constant 0 : i32
    %c0_i32_2 = arith.constant 0 : i32
    return %c0_i32, %c0_i32_0, %c0_i32_1 : i32, i32, i32
  }
  func.func @transform_11(%arg0: i32) -> (i32, i32, i32) {
    %c0_i32 = arith.constant 0 : i32
    %c0_i32_0 = arith.constant 0 : i32
    %c0_i32_1 = arith.constant 0 : i32
    %c0_i32_2 = arith.constant 0 : i32
    return %c0_i32, %c0_i32_0, %c0_i32_1 : i32, i32, i32
  }
  func.func @transform_12(%arg0: i32) -> (i32, i32, i32) {
    %c0_i32 = arith.constant 0 : i32
    %c0_i32_0 = arith.constant 0 : i32
    %c0_i32_1 = arith.constant 0 : i32
    %c0_i32_2 = arith.constant 0 : i32
    return %c0_i32, %c0_i32_0, %c0_i32_1 : i32, i32, i32
  }
  func.func @transform_13(%arg0: i32) -> (i32, i32, i32) {
    %c0_i32 = arith.constant 0 : i32
    %c0_i32_0 = arith.constant 0 : i32
    %c0_i32_1 = arith.constant 0 : i32
    %c0_i32_2 = arith.constant 0 : i32
    return %c0_i32, %c0_i32_0, %c0_i32_1 : i32, i32, i32
  }
  func.func @transform_14(%arg0: i32) -> (i32, i32, i32) {
    %c0_i32 = arith.constant 0 : i32
    %c0_i32_0 = arith.constant 0 : i32
    %c0_i32_1 = arith.constant 0 : i32
    %c0_i32_2 = arith.constant 0 : i32
    return %c0_i32, %c0_i32_0, %c0_i32_1 : i32, i32, i32
  }
  func.func @transform_15(%arg0: i32) -> (i32, i32, i32) {
    %c0_i32 = arith.constant 0 : i32
    %c0_i32_0 = arith.constant 0 : i32
    %c0_i32_1 = arith.constant 0 : i32
    %c0_i32_2 = arith.constant 0 : i32
    return %c0_i32, %c0_i32_0, %c0_i32_1 : i32, i32, i32
  }
  func.func @transform_16(%arg0: i32) -> (i32, i32, i32) {
    %c0_i32 = arith.constant 0 : i32
    %c0_i32_0 = arith.constant 0 : i32
    %c0_i32_1 = arith.constant 0 : i32
    return %arg0, %c0_i32, %c0_i32_0 : i32, i32, i32
  }
}

</mosaic_0001>

<bundles_post_ra>
// kernel: xlm_roberta_forward.1
= control target key start
LH: loop header
LB: loop body
LE: loop exit
PB: predicated region body
PF: predicated region fallthrough
CT: control target
= control target key end

     0   :  { %s2228_s21 = smov 0   ;;  %s2505_s0 = inlined_call_operand.vmem [shape: f32[2,8,32], index: 0, kind: input, shape index: {}]   ;;  %s2506_s1 = inlined_call_operand.vmem [shape: f32[2,1,8], index: 1, kind: input, shape index: {}]   ;;  %s2507_s2 = inlined_call_operand.vmem [shape: f32[1,32], index: 2, kind: input, shape index: {}]   ;;  %s2508_s3 = inlined_call_operand.vmem [shape: f32[1,32], index: 3, kind: input, shape index: {}]   ;;  %s2509_s4 = inlined_call_operand.vmem [shape: bf16[2,32,96], index: 4, kind: input, shape index: {}]   ;;  %s2510_s5 = inlined_call_operand.vmem [shape: f32[2,1,96], index: 5, kind: input, shape index: {}]   ;;  %s2511_s6 = inlined_call_operand.vmem [shape: bf16[2,32,32], index: 6, kind: input, shape index: {}]   ;;  %s2512_s7 = inlined_call_operand.vmem [shape: f32[2,1,32], index: 7, kind: input, shape index: {}]   ;;  %s2513_s8 = inlined_call_operand.vmem [shape: f32[2,1,32], index: 8, kind: input, shape index: {}]   ;;  %s2514_s9 = inlined_call_operand.vmem [shape: f32[2,1,32], index: 9, kind: input, shape index: {}]   ;;  %s2515_s10 = inlined_call_operand.vmem [shape: bf16[2,32,64], index: 10, kind: input, shape index: {}]   ;;  %s2516_s11 = inlined_call_operand.vmem [shape: f32[2,1,64], index: 11, kind: input, shape index: {}]   ;;  %s2517_s12 = inlined_call_operand.vmem [shape: bf16[2,64,32], index: 12, kind: input, shape index: {}]   ;;  %s2518_s13 = inlined_call_operand.vmem [shape: f32[2,1,32], index: 13, kind: input, shape index: {}]   ;;  %s2519_s14 = inlined_call_operand.vmem [shape: f32[2,1,32], index: 14, kind: input, shape index: {}]   ;;  %s2520_s15 = inlined_call_operand.vmem [shape: f32[2,1,32], index: 15, kind: input, shape index: {}]   ;;  %s2521_s16 = inlined_call_operand.vmem [shape: f32[2,1,32], index: 16, kind: output, shape index: {}]  }
   0x1   :  { %2523 = sst [smem:[#allocation2_spill]] %s2505_s0 }
   0x2 LB: > { %s1807_s22 = sadd.s32 4294967295, %s2133_s21   ;;  %p1811_p0 = scmp.ge.s32.totalorder %s2133_s21, 1  ;;  %s2133_s21 = sphi %s2228_s21, %s26_s21  }
   0x3   : > { %p469_p1 = scmp.lt.s32.totalorder %s2133_s21, 3 }
   0x5   : > { %p470_p2 = pnand %p1811_p0, %p469_p1 }
   0x6   : > { %p519_p3 = scmp.lt.s32.totalorder (!%p470_p2), %s1807_s22, 1  ;;  %s2524_s26 = sld [smem:[#allocation2_spill]] (!%p470_p2) }
   0x7   : > { %473 = sbr.rel (%p470_p2) target bundleno = 5099 (0x13eb), region = 84  ;;  %s2137_s25 = smov (!%p470_p2), 96  }
   0x8   : > { %s2140_s0 = smov (!%p470_p2), 48   ;;  %s2141_s17 = smov (!%p470_p2), 64  }
   0x9   : > { %s2522_s24 = smov (!%p470_p2), 16  }
   0xc   : > { %s2527_s22 = smov (!%p519_p3, %s1807_s22), 1  ;;  %vm533_vm0 = vcmask 261120   ;;  %v2077_v7 = vld [vmem:[%s2509_s4 + $0x8] sm:$0xff]   ;;  %v2135_v8 = vmov 0.0   ;;  %vm2136_vm1 = vmmov 0   ;;  %v2078_v9 = vld [vmem:[%s2509_s4] sm:$0xff]   ;;  %v636_v34 = vlaneseq }
   0xd   : > { %s1812_s23 = sshll.u32 %s2527_s22, 3  ;;  %1941 = vmatprep.subr.bf16.mxu1 %v2135_v8  ;;  %1945 = vmatprep.mubr.msk.bf16.mxu1 %vm2136_vm1, %v2135_v8  ;;  %v1813_v14 = vld [vmem:[%s2507_s2] ss:$0 sm:$0xff]  ;;  %vm644_vm2 = vcmask 130048   ;;  %s525_s30 = scalar_lea.vmem %s2506_s1, %s2527_s22  ;;  %vm691_vm3 = vcmask 64512   ;;  %vm709_vm4 = vcmask 1043456  }
   0xe   : > { %s522_s27 = scalar_lea.vmem %s2524_s26, %s1812_s23  ;;  %1942 = vmatpush3.bf16.msra.mxu1 %v2077_v7  ;;  %1955 = vmatprep.subr.bf16.mxu0 %v2135_v8  ;;  %v1814_v16 = vld [vmem:[%s2508_s3] ss:$0 sm:$0xff]  ;;  %s2138_s26 = smov 112   ;;  %v637_v37 = vshrl.u32 %v636_v34, 7  ;;  %vm1082_vm5 = vcmask 523264   ;;  %vm1749_vm6 = vcmask 253952  }
   0xf   : > { %v530_v0 = vld [vmem:[%s522_s27] sm:$0xff]  ;;  %1943 = vmatprep.subr.bf16.mxu1 %v2135_v8  ;;  %1957 = vmatprep.mubr.msk.bf16.mxu0 %vm2136_vm1, %v2135_v8  ;;  %s2139_s27 = smov 80   ;;  %s528_s18 = scalar_lea.vmem %s2521_s16, %s2527_s22 }
  0x10   : > { %v534_v1 = vsel %vm533_vm0, %v530_v0, 0.0  ;;  %v1815_v20 = vld [vmem:[%s2510_s5] ss:$0 sm:$0xff]  ;;  %v638_v39 = vsub.s32 0, %v637_v37 }
  0x11   : > { %535 = vadd.xlane.f32.xlu0 %v534_v1  ;;  %v562_v35 = vld [vmem:[%s525_s30] sm:$0x1] }
  0x12   : > { %1944 = vmatpush3.bf16.msra.mxu1 %v2078_v9  ;;  %v563_v36 = vsub.f32 1.0, %v562_v35 }
  0x13   : > { %1949 = vmatprep.subr.bf16.mxu1 %v2135_v8 }
  0x14   : > { %v564_v38 = vmul.f32 -1e+09, %v563_v36 }
  0x16   : > { %v2295_v40 = vrot.slane %v564_v38, %v638_v39  ;;  %v2081_v39 = vld [vmem:[%s2515_s10 + $0x8] sm:$0xff]  }
  0x9a   : > { %v536_v2 = vpop.xlane.xlu0 %535 }
  0x9b   : > { %v538_v3 = vmul.f32 0.03125, %v536_v2 }
  0x9d   : > { %v539_v4 = vsub.f32 %v530_v0, %v538_v3 }
  0x9f   : > { %v540_v5 = vmul.f32 %v539_v4, %v539_v4 }
  0xa1   : > { %v541_v6 = vsel %vm533_vm0, %v540_v5, 0.0 }
  0xa2   : > { %542 = vadd.xlane.f32.xlu0 %v541_v6 }
 0x12b   : > { %v543_v10 = vpop.xlane.xlu0 %542 }
 0x12c   : > { %v544_v11 = vmul.f32 0.03125, %v543_v10 }
 0x12e   : > { %v545_v12 = vadd.f32 1e-05, %v544_v11 }
 0x130   : > { %2097 = vrsqrt.f32 %v545_v12  ;;  %v2079_v12 = vld [vmem:[%s2511_s6 + $0x8] sm:$0xff]  }
 0x13d   : > { %v2098_v13 = vpop.eup %2097 }
 0x13e   : > { %v547_v15 = vmul.f32 %v2098_v13, %v539_v4  ;;  %v2080_v13 = vld [vmem:[%s2511_s6] sm:$0xff]  }
 0x140   : > { %v554_v17 = vmul.f32 %v1813_v14, %v547_v15 }
 0x142   : > { %v2264_v18 = vadd.f32 %v1814_v16, %v554_v17 }
 0x144   : > { %v565_v19 = vpack.c.bf16 %v2264_v18, %v2264_v18 }
 0x146   : > { %1946 = vmatmul.mubr.msk.bf16.vlgmr.msra.gmra.mxu1 %vm533_vm0, %v565_v19 }
 0x147   : > { %1951 = vmatprep.mubr.msk.bf16.mxu1 %vm2136_vm1, %v2135_v8 }
 0x206   : > { %v626_v21 = vpop.f32.mrf.mxu1 }
 0x207   : > { %v627_v22 = vadd.f32 %v1815_v20, %v626_v21 }
 0x208   : > { %v1947_v23 = vpop.f32.mrf.mxu1 }
 0x209   : > { %v632_v24 = vmul.f32 0.25, %v627_v22  ;;  %v2274_v25 = vpack.c.bf16 %v627_v22, %v627_v22 }
 0x20a   : > { %v629_v26 = vpop.f32.mrf.mxu1 }
 0x20b   : > { %v633_v27 = vpack.c.bf16 %v632_v24, %v632_v24  ;;  %642 = vrot.lane.b32.xlu1 %v2274_v25, %s2137_s25  ;;  %v1823_v26 = vld [vmem:[%s2512_s7] ss:$0 sm:$0xff] }
 0x20c   : > { %v1948_v28 = vpop.f32.mrf.mxu1 }
 0x20d   : > { %754 = vrot.lane.b32.xlu0 %v633_v27, %s2138_s26 }
 0x20f   : > { %756 = vrot.lane.b32.xlu1 %v2274_v25, %s2139_s27 }
 0x27d   : > { %v643_v29 = vpop.permute.xlu1 %642 }
 0x27e   : > { %v649_v30 = vsel %vm644_vm2, %v643_v29, 0 }
 0x27f   : > { %1950 = vmatpush3.bf16.xpose.msra.mxu1 %v649_v30  ;;  %v755_v33 = vpop.permute.xlu0 %754 }
 0x280   : > { %1961 = vmatprep.subr.bf16.mxu1 %v2135_v8 }
 0x281   : > { %v757_v31 = vpop.permute.xlu1 %756 }
 0x282   : > { %v762_v32 = vsel %vm644_vm2, %v757_v31, 0 }
 0x286   : > { %1952 = vmatmul.mubr.msk.bf16.vlgmr.msra.gmra.mxu1 %vm644_vm2, %v633_v27 }
 0x287   : > { %1962 = vmatpush3.bf16.xpose.msra.mxu1 %v762_v32  ;;  %1963 = vmatprep.mubr.msk.bf16.mxu1 %vm2136_vm1, %v2135_v8 }
 0x288   : > { %1973 = vmatprep.subr.bf16.mxu1 %v2135_v8 }
 0x28e   : > { %1964 = vmatmul.mubr.msk.bf16.vlgmr.msra.gmra.mxu1 %vm644_vm2, %v755_v33 }
 0x28f   : > { %1977 = vmatprep.mubr.msk.bf16.mxu1 %vm2136_vm1, %v2135_v8  ;;  %1974 = vmatpush3.bf16.msra.mxu1 %v2079_v12 }
 0x290   : > { %1975 = vmatprep.subr.bf16.mxu1 %v2135_v8 }
 0x293   : > { %1976 = vmatpush3.bf16.msra.mxu1 %v2080_v13 }
 0x294   : > { %1989 = vmatprep.subr.bf16.mxu1 %v2135_v8 }
 0x346   : > { %v685_v41 = vpop.f32.mrf.mxu1 }
 0x347   : > { %v686_v42 = vadd.f32 %v685_v41, %v2295_v40 }
 0x348   : > { %v1953_v43 = vpop.f32.mrf.mxu1 }
 0x349   : > { %v692_v44 = vsel %vm691_vm3, %v686_v42, -inf }
 0x34a   : > { %693 = vmax.xlane.f32.xlu1 %v692_v44  ;;  %v688_v45 = vpop.f32.mrf.mxu1 }
 0x34b   : > { %v1827_v45 = vld [vmem:[%s2513_s8] ss:$0 sm:$0xff] }
 0x34c   : > { %v1954_v46 = vpop.f32.mrf.mxu1 }
 0x34e   : > { %v798_v47 = vpop.f32.mrf.mxu1 }
 0x34f   : > { %v799_v48 = vadd.f32 %v798_v47, %v2295_v40  ;;  %v1828_v47 = vld [vmem:[%s2514_s9] ss:$0 sm:$0xff] }
 0x350   : > { %v1965_v49 = vpop.f32.mrf.mxu1 }
 0x351   : > { %v804_v50 = vsel %vm691_vm3, %v799_v48, -inf }
 0x352   : > { %805 = vmax.xlane.f32.xlu0 %v804_v50  ;;  %v801_v51 = vpop.f32.mrf.mxu1 }
 0x353   : > { %v2083_v51 = vld [vmem:[%s2517_s12 + $0x18] sm:$0xff]  }
 0x354   : > { %v1966_v52 = vpop.f32.mrf.mxu1 }
 0x355   : > { %v2084_v52 = vld [vmem:[%s2517_s12 + $0x10] sm:$0xff]  }
 0x368   : > { %816 = vrot.lane.b32.xlu0 %v2274_v25, %s2140_s0 }
 0x3d3   : > { %v694_v53 = vpop.xlane.xlu1 %693 }
 0x3d4   : > { %v695_v54 = vsub.f32 %v686_v42, %v694_v53  ;;  %v2085_v53 = vld [vmem:[%s2517_s12 + $0x8] sm:$0xff]  }
 0x3d6   : > { %v696_v55 = vmul.f32 1.442695, %v695_v54  ;;  %v2086_v54 = vld [vmem:[%s2517_s12] sm:$0xff]  }
 0x3d8   : > { %2099 = vpow2.f32 %v696_v55  ;;  %v1829_v55 = vld [vmem:[%s2516_s11] ss:$0 sm:$0xff] }
 0x3db   : > { %v806_v56 = vpop.xlane.xlu0 %805 }
 0x3dc   : > { %v807_v57 = vsub.f32 %v799_v48, %v806_v56 }
 0x3de   : > { %v808_v58 = vmul.f32 1.442695, %v807_v57 }
 0x3df   : > { %v817_v5 = vpop.permute.xlu0 %816 }
 0x3e0   : > { %2101 = vpow2.f32 %v808_v58  ;;  %v822_v7 = vsel %vm709_vm4, %v817_v5, 0 }
 0x3e5   : > { %v2100_v59 = vpop.eup %2099 }
 0x3e6   : > { %v698_v60 = vsel %vm691_vm3, %v2100_v59, 0.0 }
 0x3e7   : > { %699 = vadd.xlane.f32.xlu1 %v698_v60 }
 0x3ed   : > { %v2102_v61 = vpop.eup %2101 }
 0x3ee   : > { %v810_v62 = vsel %vm691_vm3, %v2102_v61, 0.0 }
 0x3ef   : > { %811 = vadd.xlane.f32.xlu1 %v810_v62 }
 0x400   : > { %704 = vrot.lane.b32.xlu1 %v2274_v25, %s2141_s17 }
 0x470   : > { %v700_v63 = vpop.xlane.xlu1 %699 }
 0x471   : > { %2103 = vrcp.f32 %v700_v63 }
 0x478   : > { %v812_v0 = vpop.xlane.xlu1 %811 }
 0x479   : > { %2105 = vrcp.f32 %v812_v0 }
 0x47c   : > { %v705_v1 = vpop.permute.xlu1 %704 }
 0x47d   : > { %v711_v2 = vsel %vm709_vm4, %v705_v1, 0 }
 0x47e   : > { %v2104_v3 = vpop.eup %2103  ;;  %1956 = vmatpush3.bf16.msra.mxu0 %v711_v2 }
 0x47f   : > { %1967 = vmatprep.subr.bf16.mxu0 %v2135_v8  ;;  %v702_v4 = vmul.f32 %v2104_v3, %v2100_v59 }
 0x481   : > { %v703_v6 = vpack.c.bf16 %v702_v4, %v702_v4 }
 0x483   : > { %1958 = vmatmul.mubr.msk.bf16.vlgmr.msra.gmra.mxu0 %vm691_vm3, %v703_v6 }
 0x484   : > { %1968 = vmatpush3.bf16.msra.mxu0 %v822_v7  ;;  %1969 = vmatprep.mubr.msk.bf16.mxu0 %vm2136_vm1, %v2135_v8  ;;  %v1833_v7 = vld [vmem:[%s2518_s13] ss:$0 sm:$0xff] }
 0x485   : > { %1981 = vmatprep.subr.bf16.mxu0 %v2135_v8 }
 0x486   : > { %v2106_v9 = vpop.eup %2105 }
 0x487   : > { %v814_v10 = vmul.f32 %v2106_v9, %v2102_v61 }
 0x489   : > { %v815_v11 = vpack.c.bf16 %v814_v10, %v814_v10 }
 0x48b   : > { %1970 = vmatmul.mubr.msk.bf16.vlgmr.msra.gmra.mxu0 %vm691_vm3, %v815_v11 }
 0x48c   : > { %1985 = vmatprep.mubr.msk.bf16.mxu0 %vm2136_vm1, %v2135_v8  ;;  %1982 = vmatpush3.bf16.msra.mxu0 %v2081_v39 }
 0x48d   : > { %1983 = vmatprep.subr.bf16.mxu0 %v2135_v8 }
 0x543   : > { %v747_v14 = vpop.f32.mrf.mxu0 }
 0x545   : > { %v1959_v15 = vpop.f32.mrf.mxu0 }
 0x547   : > { %v750_v16 = vpop.f32.mrf.mxu0 }
 0x549   : > { %v1960_v17 = vpop.f32.mrf.mxu0 }
 0x54b   : > { %v858_v19 = vpop.f32.mrf.mxu0 }
 0x54c   : > { %865 = vrot.lane.b32.xlu1 %v858_v19, %s2522_s24 }
 0x54d   : > { %v1971_v20 = vpop.f32.mrf.mxu0 }
 0x54f   : > { %v861_v21 = vpop.f32.mrf.mxu0 }
 0x551   : > { %v1972_v22 = vpop.f32.mrf.mxu0 }
 0x552   : > { %v2087_v22 = vld [vmem:[%s2509_s4 + $0x18] sm:$0xff]  }
 0x5be   : > { %v866_v23 = vpop.permute.xlu1 %865 }
 0x5bf   : > { %v868_v24 = vsel %vm644_vm2, %v747_v14, %v866_v23  ;;  %v2088_v23 = vld [vmem:[%s2509_s4 + $0x10] sm:$0xff]  }
 0x5c0   : > { %v869_v25 = vpack.c.bf16 %v868_v24, %v868_v24 }
 0x5c2   : > { %1978 = vmatmul.mubr.msk.bf16.vlgmr.msra.gmra.mxu1 %vm533_vm0, %v869_v25 }
 0x5c3   : > { %1997 = vmatprep.mubr.msk.bf16.mxu1 %vm2136_vm1, %v2135_v8  ;;  %1990 = vmatpush3.bf16.msra.mxu1 %v2083_v51 }
 0x5c4   : > { %1991 = vmatprep.subr.bf16.mxu1 %v2135_v8 }
 0x5c7   : > { %1992 = vmatpush3.bf16.msra.mxu1 %v2084_v52 }
 0x5c8   : > { %1993 = vmatprep.subr.bf16.mxu1 %v2135_v8 }
 0x5cb   : > { %1994 = vmatpush3.bf16.msra.mxu1 %v2085_v53 }
 0x5cc   : > { %1995 = vmatprep.subr.bf16.mxu1 %v2135_v8 }
 0x5cf   : > { %1996 = vmatpush3.bf16.msra.mxu1 %v2086_v54 }
 0x5d0   : > { %2015 = vmatprep.subr.bf16.mxu1 %v2135_v8 }
 0x682   : > { %v930_v27 = vpop.f32.mrf.mxu1 }
 0x683   : > { %v931_v28 = vadd.f32 %v1823_v26, %v930_v27 }
 0x684   : > { %v1979_v29 = vpop.f32.mrf.mxu1 }
 0x685   : > { %v936_v30 = vadd.f32 %v931_v28, %v2264_v18  ;;  %v2082_v18 = vld [vmem:[%s2515_s10] sm:$0xff]  }
 0x686   : > { %v933_v31 = vpop.f32.mrf.mxu1  ;;  %1984 = vmatpush3.bf16.msra.mxu0 %v2082_v18  ;;  %v1839_v28 = vld [vmem:[%s2519_s14] ss:$0 sm:$0xff] }
 0x687   : > { %v939_v32 = vsel %vm533_vm0, %v936_v30, 0.0  ;;  %2001 = vmatprep.subr.bf16.mxu0 %v2135_v8 }
 0x688   : > { %940 = vadd.xlane.f32.xlu1 %v939_v32  ;;  %v1980_v33 = vpop.f32.mrf.mxu1 }
 0x711   : > { %v941_v34 = vpop.xlane.xlu1 %940 }
 0x712   : > { %v942_v35 = vmul.f32 0.03125, %v941_v34  ;;  %v1846_v34 = vld [vmem:[%s2510_s5 + $0x1] ss:$0 sm:$0xff] }
 0x714   : > { %v943_v36 = vsub.f32 %v936_v30, %v942_v35  ;;  %v1840_v30 = vld [vmem:[%s2520_s15] ss:$0 sm:$0xff] }
 0x716   : > { %v944_v37 = vmul.f32 %v943_v36, %v943_v36 }
 0x718   : > { %v945_v38 = vsel %vm533_vm0, %v944_v37, 0.0 }
 0x719   : > { %946 = vadd.xlane.f32.xlu0 %v945_v38 }
 0x7a2   : > { %v947_v41 = vpop.xlane.xlu0 %946 }
 0x7a3   : > { %v948_v42 = vmul.f32 0.03125, %v947_v41 }
 0x7a5   : > { %v949_v43 = vadd.f32 1e-05, %v948_v42 }
 0x7a7   : > { %2107 = vrsqrt.f32 %v949_v43 }
 0x7b4   : > { %v2108_v44 = vpop.eup %2107 }
 0x7b5   : > { %v951_v46 = vmul.f32 %v2108_v44, %v943_v36 }
 0x7b7   : > { %v958_v48 = vmul.f32 %v1827_v45, %v951_v46 }
 0x7b9   : > { %v965_v49 = vadd.f32 %v1828_v47, %v958_v48 }
 0x7bb   : > { %v966_v50 = vpack.c.bf16 %v965_v49, %v965_v49 }
 0x7bd   : > { %1986 = vmatmul.mubr.msk.bf16.vlgmr.msra.gmra.mxu0 %vm533_vm0, %v966_v50 }
 0x7be   : > { %2005 = vmatprep.mubr.msk.bf16.mxu0 %vm2136_vm1, %v2135_v8  ;;  %2002 = vmatpush3.bf16.msra.mxu0 %v2087_v22 }
 0x7bf   : > { %2003 = vmatprep.subr.bf16.mxu0 %v2135_v8 }
 0x7c2   : > { %2004 = vmatpush3.bf16.msra.mxu0 %v2088_v23 }
 0x7c3   : > { %2009 = vmatprep.subr.bf16.mxu0 %v2135_v8 }
 0x87d   : > { %v1027_v56 = vpop.f32.mrf.mxu0 }
 0x87e   : > { %v1028_v57 = vadd.f32 %v1829_v55, %v1027_v56 }
 0x87f   : > { %v1987_v58 = vpop.f32.mrf.mxu0 }
 0x880   : > { %v1034_v59 = vmul.f32 0.044715, %v1028_v57  ;;  %v1033_v3 = vmul.f32 0.5, %v1028_v57 }
 0x881   : > { %v1030_v60 = vpop.f32.mrf.mxu0 }
 0x882   : > { %v1035_v61 = vmul.f32 %v1034_v59, %v1028_v57 }
 0x883   : > { %v1988_v62 = vpop.f32.mrf.mxu0 }
 0x884   : > { %v1036_v63 = vmul.f32 %v1035_v61, %v1028_v57 }
 0x886   : > { %v1037_v0 = vadd.f32 %v1036_v63, %v1028_v57 }
 0x888   : > { %v1038_v1 = vmul.f32 0.7978846, %v1037_v0 }
 0x88a   : > { %2109 = vtanh.f32 %v1038_v1 }
 0x897   : > { %v2110_v2 = vpop.eup %2109 }
 0x898   : > { %v1040_v4 = vadd.f32 1.0, %v2110_v2 }
 0x89a   : > { %v1041_v5 = vmul.f32 %v1040_v4, %v1033_v3 }
 0x89c   : > { %v1042_v6 = vpack.c.bf16 %v1041_v5, %v1041_v5 }
 0x89e   : > { %1998 = vmatmul.mubr.msk.bf16.vlgmr.msra.gmra.mxu1 %vm1082_vm5, %v1042_v6 }
 0x89f   : > { %2017 = vmatprep.mubr.msk.bf16.mxu1 %vm2136_vm1, %v2135_v8 }
 0x95e   : > { %v1120_v9 = vpop.f32.mrf.mxu1 }
 0x95f   : > { %v1121_v10 = vadd.f32 %v1833_v7, %v1120_v9 }
 0x960   : > { %v1999_v11 = vpop.f32.mrf.mxu1 }
 0x961   : > { %v1126_v12 = vadd.f32 %v1121_v10, %v965_v49 }
 0x962   : > { %v1123_v13 = vpop.f32.mrf.mxu1 }
 0x963   : > { %v1129_v14 = vsel %vm533_vm0, %v1126_v12, 0.0 }
 0x964   : > { %1130 = vadd.xlane.f32.xlu1 %v1129_v14  ;;  %v2000_v15 = vpop.f32.mrf.mxu1 }
 0x9ed   : > { %v1131_v16 = vpop.xlane.xlu1 %1130 }
 0x9ee   : > { %v1132_v17 = vmul.f32 0.03125, %v1131_v16 }
 0x9f0   : > { %v1133_v19 = vsub.f32 %v1126_v12, %v1132_v17 }
 0x9f2   : > { %v1134_v20 = vmul.f32 %v1133_v19, %v1133_v19 }
 0x9f4   : > { %v1135_v21 = vsel %vm533_vm0, %v1134_v20, 0.0  ;;  %v2090_v20 = vld [vmem:[%s2511_s6 + $0x10] sm:$0xff]  }
 0x9f5   : > { %1136 = vadd.xlane.f32.xlu1 %v1135_v21 }
 0xa7e   : > { %v1137_v24 = vpop.xlane.xlu1 %1136 }
 0xa7f   : > { %v1138_v25 = vmul.f32 0.03125, %v1137_v24 }
 0xa81   : > { %v1139_v26 = vadd.f32 1e-05, %v1138_v25 }
 0xa83   : > { %2111 = vrsqrt.f32 %v1139_v26 }
 0xa90   : > { %v2112_v27 = vpop.eup %2111 }
 0xa91   : > { %v1141_v29 = vmul.f32 %v2112_v27, %v1133_v19  ;;  %v2089_v19 = vld [vmem:[%s2511_s6 + $0x18] sm:$0xff]  }
 0xa93   : > { %v1148_v31 = vmul.f32 %v1839_v28, %v1141_v29 }
 0xa95   : > { %v2394_v32 = vadd.f32 %v1840_v30, %v1148_v31 }
 0xa97   : > { %v1156_v33 = vpack.c.bf16 %v2394_v32, %v2394_v32 }
 0xa99   : > { %2006 = vmatmul.mubr.msk.bf16.vlgmr.msra.gmra.mxu0 %vm533_vm0, %v1156_v33  ;;  %v1859_v33 = vld [vmem:[%s2512_s7 + $0x1] ss:$0 sm:$0xff] }
 0xa9a   : > { %2011 = vmatprep.mubr.msk.bf16.mxu0 %vm2136_vm1, %v2135_v8 }
 0xb59   : > { %v1219_v35 = vpop.f32.mrf.mxu0 }
 0xb5a   : > { %v1220_v36 = vadd.f32 %v1846_v34, %v1219_v35 }
 0xb5b   : > { %v2007_v37 = vpop.f32.mrf.mxu0 }
 0xb5c   : > { %v1225_v38 = vmul.f32 0.25, %v1220_v36  ;;  %v1227_v39 = vpack.c.bf16 %v1220_v36, %v1220_v36 }
 0xb5d   : > { %v1222_v18 = vpop.f32.mrf.mxu0 }
 0xb5e   : > { %1340 = vrot.lane.b32.xlu1 %v1227_v39, %s2139_s27  ;;  %1229 = vrot.lane.b32.xlu0 %v1227_v39, %s2137_s25  ;;  %v1226_v42 = vpack.c.bf16 %v1225_v38, %v1225_v38 }
 0xb5f   : > { %v2008_v41 = vpop.f32.mrf.mxu0 }
 0xb62   : > { %1338 = vrot.lane.b32.xlu1 %v1226_v42, %s2138_s26 }
 0xbd0   : > { %v1230_v43 = vpop.permute.xlu0 %1229  ;;  %v1341_v45 = vpop.permute.xlu1 %1340 }
 0xbd1   : > { %v1235_v44 = vsel %vm644_vm2, %v1230_v43, 0  ;;  %v1346_v46 = vsel %vm644_vm2, %v1341_v45, 0 }
 0xbd2   : > { %2010 = vmatpush3.bf16.xpose.msra.mxu0 %v1235_v44 }
 0xbd3   : > { %2021 = vmatprep.subr.bf16.mxu0 %v2135_v8 }
 0xbd4   : > { %v1339_v47 = vpop.permute.xlu1 %1338 }
 0xbd9   : > { %2012 = vmatmul.mubr.msk.bf16.vlgmr.msra.gmra.mxu0 %vm644_vm2, %v1226_v42 }
 0xbda   : > { %2022 = vmatpush3.bf16.xpose.msra.mxu0 %v1346_v46  ;;  %2023 = vmatprep.mubr.msk.bf16.mxu0 %vm2136_vm1, %v2135_v8  ;;  %v2091_v46 = vld [vmem:[%s2515_s10 + $0x18] sm:$0xff]  }
 0xbdb   : > { %2033 = vmatprep.subr.bf16.mxu0 %v2135_v8 }
 0xbe1   : > { %2024 = vmatmul.mubr.msk.bf16.vlgmr.msra.gmra.mxu0 %vm644_vm2, %v1339_v47 }
 0xbe2   : > { %2037 = vmatprep.mubr.msk.bf16.mxu0 %vm2136_vm1, %v2135_v8  ;;  %2034 = vmatpush3.bf16.msra.mxu0 %v2089_v19 }
 0xbe3   : > { %2035 = vmatprep.subr.bf16.mxu0 %v2135_v8 }
 0xbe6   : > { %2036 = vmatpush3.bf16.msra.mxu0 %v2090_v20 }
 0xbe7   : > { %2049 = vmatprep.subr.bf16.mxu0 %v2135_v8 }
 0xc99   : > { %v1271_v48 = vpop.f32.mrf.mxu0 }
 0xc9a   : > { %v1272_v49 = vadd.f32 %v1271_v48, %v2295_v40 }
 0xc9b   : > { %v2013_v50 = vpop.f32.mrf.mxu0 }
 0xc9c   : > { %v1277_v51 = vsel %vm691_vm3, %v1272_v49, -inf }
 0xc9d   : > { %1278 = vmax.xlane.f32.xlu0 %v1277_v51  ;;  %v1274_v52 = vpop.f32.mrf.mxu0  ;;  %v1865_v51 = vld [vmem:[%s2513_s8 + $0x1] ss:$0 sm:$0xff] }
 0xc9f   : > { %v2014_v53 = vpop.f32.mrf.mxu0 }
 0xca0   : > { %v1866_v53 = vld [vmem:[%s2514_s9 + $0x1] ss:$0 sm:$0xff] }
 0xca1   : > { %v1382_v54 = vpop.f32.mrf.mxu0 }
 0xca2   : > { %v1383_v55 = vadd.f32 %v1382_v54, %v2295_v40 }
 0xca3   : > { %v2025_v56 = vpop.f32.mrf.mxu0 }
 0xca4   : > { %v1388_v57 = vsel %vm691_vm3, %v1383_v55, -inf }
 0xca5   : > { %1389 = vmax.xlane.f32.xlu1 %v1388_v57  ;;  %v1385_v58 = vpop.f32.mrf.mxu0  ;;  %v2093_v57 = vld [vmem:[%s2517_s12 + $0x38] sm:$0xff]  }
 0xca6   : > { %v2094_v58 = vld [vmem:[%s2517_s12 + $0x30] sm:$0xff]  }
 0xca7   : > { %v2026_v59 = vpop.f32.mrf.mxu0 }
 0xca8   : > { %v2095_v59 = vld [vmem:[%s2517_s12 + $0x28] sm:$0xff]  }
 0xcb6   : > { %1289 = vrot.lane.b32.xlu1 %v1227_v39, %s2141_s17  ;;  %s2525_s17 = smov 16  }
 0xd26   : > { %v1279_v60 = vpop.xlane.xlu0 %1278 }
 0xd27   : > { %v1280_v61 = vsub.f32 %v1272_v49, %v1279_v60  ;;  %v2096_v60 = vld [vmem:[%s2517_s12 + $0x20] sm:$0xff]  }
 0xd29   : > { %v1281_v62 = vmul.f32 1.442695, %v1280_v61  ;;  %v1872_v61 = vld [vmem:[%s2516_s11 + $0x1] ss:$0 sm:$0xff] }
 0xd2b   : > { %2113 = vpow2.f32 %v1281_v62 }
 0xd2e   : > { %v1390_v63 = vpop.xlane.xlu1 %1389 }
 0xd2f   : > { %v1391_v0 = vsub.f32 %v1383_v55, %v1390_v63 }
 0xd31   : > { %v1392_v1 = vmul.f32 1.442695, %v1391_v0 }
 0xd32   : > { %v1290_v2 = vpop.permute.xlu1 %1289 }
 0xd33   : > { %2115 = vpow2.f32 %v1392_v1  ;;  %v1295_v3 = vsel %vm709_vm4, %v1290_v2, 0 }
 0xd34   : > { %2016 = vmatpush3.bf16.msra.mxu1 %v1295_v3 }
 0xd35   : > { %2027 = vmatprep.subr.bf16.mxu1 %v2135_v8 }
 0xd38   : > { %v2114_v40 = vpop.eup %2113 }
 0xd39   : > { %v1283_v4 = vsel %vm691_vm3, %v2114_v40, 0.0 }
 0xd3a   : > { %1284 = vadd.xlane.f32.xlu0 %v1283_v4 }
 0xd40   : > { %v2116_v5 = vpop.eup %2115 }
 0xd41   : > { %v1394_v6 = vsel %vm691_vm3, %v2116_v5, 0.0 }
 0xd42   : > { %1395 = vadd.xlane.f32.xlu0 %v1394_v6 }
 0xd58   : > { %1400 = vrot.lane.b32.xlu0 %v1227_v39, %s2140_s0 }
 0xdc3   : > { %v1285_v7 = vpop.xlane.xlu0 %1284 }
 0xdc4   : > { %2117 = vrcp.f32 %v1285_v7 }
 0xdcb   : > { %v1396_v9 = vpop.xlane.xlu0 %1395 }
 0xdcc   : > { %2119 = vrcp.f32 %v1396_v9 }
 0xdcf   : > { %v1401_v12 = vpop.permute.xlu0 %1400 }
 0xdd0   : > { %v1406_v14 = vsel %vm709_vm4, %v1401_v12, 0  ;;  %v1885_v12 = vld [vmem:[%s2518_s13 + $0x1] ss:$0 sm:$0xff] }
 0xdd1   : > { %v2118_v10 = vpop.eup %2117 }
 0xdd2   : > { %v1287_v11 = vmul.f32 %v2118_v10, %v2114_v40 }
 0xdd4   : > { %v1288_v13 = vpack.c.bf16 %v1287_v11, %v1287_v11 }
 0xdd6   : > { %2018 = vmatmul.mubr.msk.bf16.vlgmr.msra.gmra.mxu1 %vm691_vm3, %v1288_v13 }
 0xdd7   : > { %2028 = vmatpush3.bf16.msra.mxu1 %v1406_v14  ;;  %2029 = vmatprep.mubr.msk.bf16.mxu1 %vm2136_vm1, %v2135_v8 }
 0xdd8   : > { %2041 = vmatprep.subr.bf16.mxu1 %v2135_v8 }
 0xdd9   : > { %v2120_v15 = vpop.eup %2119 }
 0xdda   : > { %v1398_v16 = vmul.f32 %v2120_v15, %v2116_v5 }
 0xddc   : > { %v1399_v17 = vpack.c.bf16 %v1398_v16, %v1398_v16 }
 0xdde   : > { %2030 = vmatmul.mubr.msk.bf16.vlgmr.msra.gmra.mxu1 %vm691_vm3, %v1399_v17 }
 0xddf   : > { %2045 = vmatprep.mubr.msk.bf16.mxu1 %vm2136_vm1, %v2135_v8  ;;  %2042 = vmatpush3.bf16.msra.mxu1 %v2091_v46 }
 0xde0   : > { %2043 = vmatprep.subr.bf16.mxu1 %v2135_v8 }
 0xe96   : > { %v1331_v21 = vpop.f32.mrf.mxu1 }
 0xe98   : > { %v2019_v22 = vpop.f32.mrf.mxu1 }
 0xe9a   : > { %v1334_v23 = vpop.f32.mrf.mxu1 }
 0xe9c   : > { %v2020_v24 = vpop.f32.mrf.mxu1 }
 0xe9e   : > { %v1442_v25 = vpop.f32.mrf.mxu1 }
 0xe9f   : > { %1449 = vrot.lane.b32.xlu1 %v1442_v25, %s2525_s17 }
 0xea0   : > { %v2031_v26 = vpop.f32.mrf.mxu1 }
 0xea2   : > { %v1445_v27 = vpop.f32.mrf.mxu1 }
 0xea4   : > { %v2032_v28 = vpop.f32.mrf.mxu1 }
 0xf11   : > { %v1450_v29 = vpop.permute.xlu1 %1449 }
 0xf12   : > { %v1452_v30 = vsel %vm644_vm2, %v1331_v21, %v1450_v29 }
 0xf13   : > { %v1453_v31 = vpack.c.bf16 %v1452_v30, %v1452_v30  ;;  %v1893_v30 = vld [vmem:[%s2519_s14 + $0x1] ss:$0 sm:$0xff] }
 0xf15   : > { %2038 = vmatmul.mubr.msk.bf16.vlgmr.msra.gmra.mxu0 %vm533_vm0, %v1453_v31 }
 0xf16   : > { %2057 = vmatprep.mubr.msk.bf16.mxu0 %vm2136_vm1, %v2135_v8  ;;  %2050 = vmatpush3.bf16.msra.mxu0 %v2093_v57 }
 0xf17   : > { %2051 = vmatprep.subr.bf16.mxu0 %v2135_v8 }
 0xf1a   : > { %2052 = vmatpush3.bf16.msra.mxu0 %v2094_v58 }
 0xf1b   : > { %2053 = vmatprep.subr.bf16.mxu0 %v2135_v8 }
 0xf1e   : > { %2054 = vmatpush3.bf16.msra.mxu0 %v2095_v59 }
 0xf1f   : > { %2055 = vmatprep.subr.bf16.mxu0 %v2135_v8 }
 0xf22   : > { %2056 = vmatpush3.bf16.msra.mxu0 %v2096_v60 }
 0xfd5   : > { %v1516_v34 = vpop.f32.mrf.mxu0 }
 0xfd6   : > { %v1517_v35 = vadd.f32 %v1859_v33, %v1516_v34  ;;  %v1894_v33 = vld [vmem:[%s2520_s15 + $0x1] ss:$0 sm:$0xff] }
 0xfd7   : > { %v2039_v36 = vpop.f32.mrf.mxu0 }
 0xfd8   : > { %v1522_v37 = vadd.f32 %v1517_v35, %v2394_v32  ;;  %v2092_v32 = vld [vmem:[%s2515_s10 + $0x10] sm:$0xff]  }
 0xfd9   : > { %v1519_v38 = vpop.f32.mrf.mxu0  ;;  %2044 = vmatpush3.bf16.msra.mxu1 %v2092_v32 }
 0xfda   : > { %v1527_v39 = vsel %vm533_vm0, %v1522_v37, 0.0 }
 0xfdb   : > { %1528 = vadd.xlane.f32.xlu1 %v1527_v39  ;;  %v2040_v18 = vpop.f32.mrf.mxu0 }
0x1064   : > { %v1529_v41 = vpop.xlane.xlu1 %1528 }
0x1065   : > { %v1530_v42 = vmul.f32 0.03125, %v1529_v41 }
0x1067   : > { %v1531_v43 = vsub.f32 %v1522_v37, %v1530_v42 }
0x1069   : > { %v1532_v44 = vmul.f32 %v1531_v43, %v1531_v43 }
0x106b   : > { %v1533_v45 = vsel %vm533_vm0, %v1532_v44, 0.0 }
0x106c   : > { %1534 = vadd.xlane.f32.xlu0 %v1533_v45 }
0x10f5   : > { %v1535_v47 = vpop.xlane.xlu0 %1534 }
0x10f6   : > { %v1536_v48 = vmul.f32 0.03125, %v1535_v47 }
0x10f8   : > { %v1537_v49 = vadd.f32 1e-05, %v1536_v48 }
0x10fa   : > { %2121 = vrsqrt.f32 %v1537_v49 }
0x1107   : > { %v2122_v50 = vpop.eup %2121 }
0x1108   : > { %v1539_v52 = vmul.f32 %v2122_v50, %v1531_v43 }
0x110a   : > { %v1546_v54 = vmul.f32 %v1865_v51, %v1539_v52 }
0x110c   : > { %v1553_v55 = vadd.f32 %v1866_v53, %v1546_v54 }
0x110e   : > { %v1554_v56 = vpack.c.bf16 %v1553_v55, %v1553_v55 }
0x1110   : > { %2046 = vmatmul.mubr.msk.bf16.vlgmr.msra.gmra.mxu1 %vm533_vm0, %v1554_v56 }
0x11d0   : > { %v1617_v62 = vpop.f32.mrf.mxu1 }
0x11d1   : > { %v1618_v63 = vadd.f32 %v1872_v61, %v1617_v62 }
0x11d2   : > { %v2047_v0 = vpop.f32.mrf.mxu1 }
0x11d3   : > { %v1624_v1 = vmul.f32 0.044715, %v1618_v63  ;;  %v1623_v9 = vmul.f32 0.5, %v1618_v63 }
0x11d4   : > { %v1620_v2 = vpop.f32.mrf.mxu1 }
0x11d5   : > { %v1625_v3 = vmul.f32 %v1624_v1, %v1618_v63 }
0x11d6   : > { %v2048_v40 = vpop.f32.mrf.mxu1 }
0x11d7   : > { %v1626_v4 = vmul.f32 %v1625_v3, %v1618_v63 }
0x11d9   : > { %v1627_v5 = vadd.f32 %v1626_v4, %v1618_v63 }
0x11db   : > { %v1628_v6 = vmul.f32 0.7978846, %v1627_v5 }
0x11dd   : > { %2123 = vtanh.f32 %v1628_v6 }
0x11ea   : > { %v2124_v7 = vpop.eup %2123 }
0x11eb   : > { %v1630_v10 = vadd.f32 1.0, %v2124_v7 }
0x11ed   : > { %v1631_v8 = vmul.f32 %v1630_v10, %v1623_v9 }
0x11ef   : > { %v1632_v11 = vpack.c.bf16 %v1631_v8, %v1631_v8 }
0x11f1   : > { %2058 = vmatmul.mubr.msk.bf16.vlgmr.msra.gmra.mxu0 %vm1082_vm5, %v1632_v11 }
0x12b1   : > { %v1711_v13 = vpop.f32.mrf.mxu0 }
0x12b2   : > { %v1712_v14 = vadd.f32 %v1885_v12, %v1711_v13 }
0x12b3   : > { %v2059_v15 = vpop.f32.mrf.mxu0 }
0x12b4   : > { %v1717_v16 = vadd.f32 %v1712_v14, %v1553_v55 }
0x12b5   : > { %v1714_v17 = vpop.f32.mrf.mxu0 }
0x12b6   : > { %v1722_v19 = vsel %vm533_vm0, %v1717_v16, 0.0 }
0x12b7   : > { %1723 = vadd.xlane.f32.xlu0 %v1722_v19  ;;  %v2060_v20 = vpop.f32.mrf.mxu0 }
0x1340   : > { %v1724_v21 = vpop.xlane.xlu0 %1723 }
0x1341   : > { %v1725_v22 = vmul.f32 0.03125, %v1724_v21 }
0x1343   : > { %v1726_v23 = vsub.f32 %v1717_v16, %v1725_v22 }
0x1345   : > { %v1727_v24 = vmul.f32 %v1726_v23, %v1726_v23 }
0x1347   : > { %v1728_v25 = vsel %vm533_vm0, %v1727_v24, 0.0 }
0x1348   : > { %1729 = vadd.xlane.f32.xlu1 %v1728_v25 }
0x13d1   : > { %v1730_v26 = vpop.xlane.xlu1 %1729 }
0x13d2   : > { %v1731_v27 = vmul.f32 0.03125, %v1730_v26 }
0x13d4   : > { %v1732_v28 = vadd.f32 1e-05, %v1731_v27 }
0x13d6   : > { %2125 = vrsqrt.f32 %v1732_v28 }
0x13e3   : > { %v2126_v29 = vpop.eup %2125 }
0x13e4   : > { %v1734_v31 = vmul.f32 %v2126_v29, %v1726_v23 }
0x13e6   : > { %v1741_v34 = vmul.f32 %v1893_v30, %v1734_v31 }
0x13e8   : > { %v1748_v35 = vadd.f32 %v1894_v33, %v1741_v34 }
0x13ea   : > { %1750 = vst.msk [vmem:[%s528_s18] sm:$0x1] %vm1749_vm6, %v1748_v35 }
0x13eb PF: > { %s26_s21 = sadd.s32 1, %s2133_s21  }
0x13ec   : > { %p23_p4 = scmp.ge.s32.totalorder %s26_s21, 4  }
0x13ee   :  { %25 = sbr.rel (!%p23_p4) target bundleno = 2 (0x2), region = 129 }

</bundles_post_ra>
